<compile_context>
chip_gen: v6e
topology: v6e:2x2x1
jax: 0.10.0
libtpu: 0.0.40
codegen_flags: <defaults>
</compile_context>

<pallas_src>
import jax
import jax.numpy as jnp
import numpy as np
from jax import lax
from jax.experimental import pallas as pl
from jax.experimental.pallas import tpu as pltpu

VOCAB = 16
EMBED = 8          # embed_dim == conv1 in-channels
H = W = 10         # inp_size = (10, 10): three valid 3x3 convs -> 4x4, 12*4*4 = 192
OUT_DIM = 32
B = 2

LC = 128                   # padded lane width for conv activations / fc1 column blocks
OH = B * W * VOCAB         # 320: one-hot lane width (b, p, v)
GW = 4 * LC                # 512: gbuf width == fc1 matmul N (4 q-row blocks of 128)

# ---- gbuf row layout (width GW = 512) ----
GC_ROW = 0                 # fc1 weight Gc: rows [0, 128)
R0_ROW = 128               # batch-0 replication matrix: rows [128, 138), lanes [0, 320)
R1_ROW = 144               # batch-1 replication matrix: rows [144, 154)
IOTA_ROW = 160             # vocab lane-iota: row 160, lanes [0, 320)
G_ROWS = 168

# ---- wbuf row layout (width LC = 128), all band starts 8-row aligned ----
W1_ROW, W1_K = 0, OH       # conv1 (embedding-folded) taps: 3 x (320, 128) -> rows [0, 960)
B1_ROW = 960
W2_ROW, W2_K = 968, LC     # conv2 taps: 3 x (128, 128) -> rows [968, 1352)
B2_ROW = 1352
W3_ROW, W3_K = 1360, LC    # conv3 taps: 3 x (128, 128) -> rows [1360, 1744)
B3_ROW = 1744
FB_ROW = 1752              # fc1 bias (lanes [0, 64))
W_ROWS = 1760


def object_model_kernel(ids_ref, gbuf_ref, wbuf_ref, o_ref):
    f32 = jnp.float32

    # ---- embedding lookup as one-hot (exact integer equality against a lane iota) ----
    # idx[q, (b*10+p)*16 + v] = ids[b, q, p]
    # NOTE: two tiny per-batch replication matmuls are kept (a true merge into one matmul
    # would need an input lane-concat / wrapper relayout that costs about as much).
    idx = (jnp.dot(ids_ref[0].astype(f32), gbuf_ref[R0_ROW:R0_ROW + W, :OH],
                   preferred_element_type=f32) +
           jnp.dot(ids_ref[1].astype(f32), gbuf_ref[R1_ROW:R1_ROW + W, :OH],
                   preferred_element_type=f32))                                # (10, 320)
    onehot = (idx == gbuf_ref[IOTA_ROW:IOTA_ROW + 1, :OH]).astype(f32)         # (10, 320)

    # ---- three valid 3x3 convs: 3 block-banded matmuls each (one per q-tap) ----
    # The embedding table is pre-folded into the conv1 weights, so `onehot` feeds conv1
    # directly.  The q-tap shifts are value slices of vreg-resident slabs (no ref DMA).
    def conv(x, w_row, kdim, b_row, ho):
        acc = jnp.dot(x[0:ho], wbuf_ref[w_row:w_row + kdim, :],
                      preferred_element_type=f32)
        acc = acc + jnp.dot(x[1:1 + ho], wbuf_ref[w_row + kdim:w_row + 2 * kdim, :],
                            preferred_element_type=f32)
        acc = acc + jnp.dot(x[2:2 + ho], wbuf_ref[w_row + 2 * kdim:w_row + 3 * kdim, :],
                            preferred_element_type=f32)
        return jnp.maximum(acc + wbuf_ref[b_row:b_row + 1, :], 0.0)

    h1 = conv(onehot, W1_ROW, W1_K, B1_ROW, 8)     # (8, 128), valid lanes [0, 48)
    h2 = conv(h1,     W2_ROW, W2_K, B2_ROW, 6)     # (6, 128), valid lanes [0, 72)
    h3 = conv(h2,     W3_ROW, W3_K, B3_ROW, 4)     # (4, 128), valid lanes [0, 96)

    # ---- fc1: one (4,128)@(128,512) matmul, then sum the 4 diagonal 128-lane blocks ----
    y = jnp.dot(h3, gbuf_ref[GC_ROW:GC_ROW + LC, :], preferred_element_type=f32)  # (4, 512)
    out = (wbuf_ref[FB_ROW:FB_ROW + 1, :]
           + y[0:1, 0:LC] + y[1:2, LC:2 * LC]
           + y[2:3, 2 * LC:3 * LC] + y[3:4, 3 * LC:4 * LC])                       # (1, 128)
    o_ref[...] = out


def prepare_params(params):
    """One-time re-layout of the PyTorch-style params into two packed kernel buffers."""
    emb_t, w1, b1, w2, b2, w3, b3, fcw, fcb = [np.asarray(p, np.float32) for p in params]

    wbuf = np.zeros((W_ROWS, LC), np.float32)
    gbuf = np.zeros((G_ROWS, GW), np.float32)

    # Fold the embedding into conv1:  V1[v, c, kh, kw] = sum_e emb_t[v, e] * w1[c, e, kh, kw]
    V1 = np.einsum('ve,cehw->vchw', emb_t, w1)                      # (16, 3, 3, 3)

    # conv1 banded weights over the one-hot input:
    #   wbuf[t*320 + b*160 + (po+kh)*16 + v,  b*24 + po*3 + c] = V1[v, c, kh, t]
    Po1, Co1 = H - 2, 3
    for t in range(3):
        for b in range(B):
            for po in range(Po1):
                for kh in range(3):
                    r = W1_ROW + t * W1_K + b * W * VOCAB + (po + kh) * VOCAB
                    c0 = b * Po1 * Co1 + po * Co1
                    wbuf[r:r + VOCAB, c0:c0 + Co1] = V1[:, :, kh, t]
    wbuf[B1_ROW, :B * Po1 * Co1] = np.tile(b1, B * Po1)

    # generic banded conv weights:
    #   wbuf[row0 + t*kdim + b*Pi*Ci + (po+kh)*Ci + ci,  b*Po*Co + po*Co + c] = w[c, ci, kh, t]
    def fill_banded(w, Pi, row0, kdim):
        Co, Ci, KH, KW = w.shape
        Po = Pi - KH + 1
        for t in range(KW):
            for b in range(B):
                for po in range(Po):
                    for kh in range(KH):
                        r = row0 + t * kdim + b * Pi * Ci + (po + kh) * Ci
                        c0 = b * Po * Co + po * Co
                        wbuf[r:r + Ci, c0:c0 + Co] = w[:, :, kh, t].T
        return Po, Co

    Po2, Co2 = fill_banded(w2, Po1, W2_ROW, W2_K)                   # 6, 6
    wbuf[B2_ROW, :B * Po2 * Co2] = np.tile(b2, B * Po2)
    Po3, Co3 = fill_banded(w3, Po2, W3_ROW, W3_K)                   # 4, 12
    wbuf[B3_ROW, :B * Po3 * Co3] = np.tile(b3, B * Po3)
    wbuf[FB_ROW, :B * OUT_DIM] = np.tile(fcb, B)

    # fc1 weight, 128-wide vreg-aligned q-row blocks:
    #   gbuf[b*48 + po*12 + c,  qo*128 + b*32 + o] = fcw[o, c*16 + po*4 + qo]
    for qo in range(4):
        for b in range(B):
            for po in range(4):
                for c in range(12):
                    gbuf[GC_ROW + b * 48 + po * 12 + c,
                         qo * LC + b * OUT_DIM: qo * LC + (b + 1) * OUT_DIM] = \
                        fcw[:, c * 16 + po * 4 + qo]

    # replication matrices and vocab iota for the in-kernel one-hot
    for b in range(B):
        row0 = R0_ROW if b == 0 else R1_ROW
        for p in range(W):
            base = (b * W + p) * VOCAB
            gbuf[row0 + p, base:base + VOCAB] = 1.0
            gbuf[IOTA_ROW, base:base + VOCAB] = np.arange(VOCAB, dtype=np.float32)

    return jnp.asarray(gbuf), jnp.asarray(wbuf)


@jax.jit
def object_model_forward(ids, prep):
    gbuf, wbuf = prep
    out = pl.pallas_call(
        object_model_kernel,
        out_shape=jax.ShapeDtypeStruct((1, LC), jnp.float32),   # lane-dense (1, 128) store
        in_specs=[pl.BlockSpec(memory_space=pltpu.MemorySpace.VMEM)] * 3,
        out_specs=pl.BlockSpec(memory_space=pltpu.MemorySpace.VMEM),
    )(ids, gbuf, wbuf)
    # valid result lives in lanes [0, B*32); row-major, so this is a cheap slice + bitcast
    return out[:, :B * OUT_DIM].reshape(B, OUT_DIM)


def reference_forward(ids, params):
    """Pure-JAX mirror of the PyTorch forward (for correctness check)."""
    emb_t, w1, b1, w2, b2, w3, b3, fcw, fcb = params
    emb = jnp.take(emb_t, ids.reshape(-1), axis=0).reshape(B, H, W, EMBED)
    x = jnp.transpose(emb, (0, 3, 2, 1))            # transpose(1, -1) -> NCHW
    dn = ('NCHW', 'OIHW', 'NCHW')
    x = jax.nn.relu(lax.conv_general_dilated(x, w1, (1, 1), 'VALID',
                                             dimension_numbers=dn) + b1[None, :, None, None])
    x = jax.nn.relu(lax.conv_general_dilated(x, w2, (1, 1), 'VALID',
                                             dimension_numbers=dn) + b2[None, :, None, None])
    x = jax.nn.relu(lax.conv_general_dilated(x, w3, (1, 1), 'VALID',
                                             dimension_numbers=dn) + b3[None, :, None, None])
    x = x.reshape(B, 192)
    return x @ fcw.T + fcb


def init_params(key):
    ks = jax.random.split(key, 9)
    emb_t = jax.random.normal(ks[0], (VOCAB, EMBED), jnp.float32)
    emb_t = emb_t.at[0].set(0.0)                    # padding_idx=0 -> zero row

    def u(k, shape, fan_in):
        bound = 1.0 / float(np.sqrt(fan_in))
        return jax.random.uniform(k, shape, jnp.float32, -bound, bound)

    w1 = u(ks[1], (3, EMBED, 3, 3), EMBED * 9); b1 = u(ks[2], (3,), EMBED * 9)
    w2 = u(ks[3], (6, 3, 3, 3), 3 * 9);         b2 = u(ks[4], (6,), 3 * 9)
    w3 = u(ks[5], (12, 6, 3, 3), 6 * 9);        b3 = u(ks[6], (12,), 6 * 9)
    fcw = u(ks[7], (OUT_DIM, 192), 192);        fcb = u(ks[8], (OUT_DIM,), 192)
    return (emb_t, w1, b1, w2, b2, w3, b3, fcw, fcb)


if __name__ == "__main__":
    key = jax.random.PRNGKey(0)
    kp, kx = jax.random.split(key)
    params = init_params(kp)
    ids = jax.random.randint(kx, (B, H, W), 0, VOCAB, dtype=jnp.int32)

    prep = prepare_params(params)   # one-time parameter packing (out of the hot path)

    # TODO(synk): torch's `.squeeze()` would drop the batch dim when B == 1; this
    # implementation (like the reference) assumes B >= 2, and prepare_params hard-codes B=2.
    out = object_model_forward(ids, prep)
    out = jax.block_until_ready(out)
    assert out.shape == (B, OUT_DIM)

    ref = reference_forward(ids, params)
    np.testing.assert_allclose(np.asarray(out), np.asarray(ref), rtol=5e-4, atol=5e-4)

    print("KERNEL_OK")
</pallas_src>

<mosaic_0001>
module attributes {stable_mosaic.version = 11 : i64} {
  func.func @object_model_kernel(%arg0: memref<2x10x10xi32, #tpu.memory_space<vmem>>, %arg1: memref<168x512xf32, #tpu.memory_space<vmem>>, %arg2: memref<1760x128xf32, #tpu.memory_space<vmem>>, %arg3: memref<1x128xf32, #tpu.memory_space<vmem>>) attributes {dimension_semantics = [], scalar_prefetch = 0 : i64, scratch_operands = 0 : i64, tpu.core_type = #tpu.core_type<tc>} {
    %c0 = arith.constant 0 : index
    %c0_0 = arith.constant 0 : index
    %c0_1 = arith.constant 0 : index
    %0 = vector.load %arg0[%c0, %c0_0, %c0_1] : memref<2x10x10xi32, #tpu.memory_space<vmem>>, vector<1x10x10xi32>
    %1 = vector.shape_cast %0 : vector<1x10x10xi32> to vector<10x10xi32>
    %2 = arith.sitofp %1 : vector<10x10xi32> to vector<10x10xf32>
    %c128 = arith.constant 128 : index
    %c0_2 = arith.constant 0 : index
    %3 = vector.load %arg1[%c128, %c0_2] : memref<168x512xf32, #tpu.memory_space<vmem>>, vector<10x320xf32>
    %cst = arith.constant dense<0.000000e+00> : vector<10x320xf32>
    %4 = tpu.matmul %2, %3, %cst {dimension_numbers = #tpu.dot_dimension_numbers<[1], [0], [0], [1], [0, 0, 1, 1], [], []>} : vector<10x10xf32>, vector<10x320xf32>, vector<10x320xf32> -> vector<10x320xf32>
    %c1 = arith.constant 1 : index
    %c0_3 = arith.constant 0 : index
    %c0_4 = arith.constant 0 : index
    %5 = vector.load %arg0[%c1, %c0_3, %c0_4] : memref<2x10x10xi32, #tpu.memory_space<vmem>>, vector<1x10x10xi32>
    %6 = vector.shape_cast %5 : vector<1x10x10xi32> to vector<10x10xi32>
    %7 = arith.sitofp %6 : vector<10x10xi32> to vector<10x10xf32>
    %c144 = arith.constant 144 : index
    %c0_5 = arith.constant 0 : index
    %8 = vector.load %arg1[%c144, %c0_5] : memref<168x512xf32, #tpu.memory_space<vmem>>, vector<10x320xf32>
    %cst_6 = arith.constant dense<0.000000e+00> : vector<10x320xf32>
    %9 = tpu.matmul %7, %8, %cst_6 {dimension_numbers = #tpu.dot_dimension_numbers<[1], [0], [0], [1], [0, 0, 1, 1], [], []>} : vector<10x10xf32>, vector<10x320xf32>, vector<10x320xf32> -> vector<10x320xf32>
    %10 = arith.addf %4, %9 : vector<10x320xf32>
    %c160 = arith.constant 160 : index
    %c0_7 = arith.constant 0 : index
    %11 = vector.load %arg1[%c160, %c0_7] : memref<168x512xf32, #tpu.memory_space<vmem>>, vector<1x320xf32>
    %12 = vector.broadcast %11 : vector<1x320xf32> to vector<10x320xf32>
    %13 = arith.cmpf oeq, %10, %12 : vector<10x320xf32>
    %14 = arith.extui %13 : vector<10x320xi1> to vector<10x320xi32>
    %15 = arith.sitofp %14 : vector<10x320xi32> to vector<10x320xf32>
    %16 = vector.extract_strided_slice %15 {offsets = [0, 0], sizes = [8, 320], strides = [1, 1]} : vector<10x320xf32> to vector<8x320xf32>
    %c0_8 = arith.constant 0 : index
    %c0_9 = arith.constant 0 : index
    %17 = vector.load %arg2[%c0_8, %c0_9] : memref<1760x128xf32, #tpu.memory_space<vmem>>, vector<320x128xf32>
    %cst_10 = arith.constant dense<0.000000e+00> : vector<8x128xf32>
    %18 = tpu.matmul %16, %17, %cst_10 {dimension_numbers = #tpu.dot_dimension_numbers<[1], [0], [0], [1], [0, 0, 1, 1], [], []>} : vector<8x320xf32>, vector<320x128xf32>, vector<8x128xf32> -> vector<8x128xf32>
    %19 = vector.extract_strided_slice %15 {offsets = [1, 0], sizes = [8, 320], strides = [1, 1]} : vector<10x320xf32> to vector<8x320xf32>
    %c320 = arith.constant 320 : index
    %c0_11 = arith.constant 0 : index
    %20 = vector.load %arg2[%c320, %c0_11] : memref<1760x128xf32, #tpu.memory_space<vmem>>, vector<320x128xf32>
    %cst_12 = arith.constant dense<0.000000e+00> : vector<8x128xf32>
    %21 = tpu.matmul %19, %20, %cst_12 {dimension_numbers = #tpu.dot_dimension_numbers<[1], [0], [0], [1], [0, 0, 1, 1], [], []>} : vector<8x320xf32>, vector<320x128xf32>, vector<8x128xf32> -> vector<8x128xf32>
    %22 = arith.addf %18, %21 : vector<8x128xf32>
    %23 = vector.extract_strided_slice %15 {offsets = [2, 0], sizes = [8, 320], strides = [1, 1]} : vector<10x320xf32> to vector<8x320xf32>
    %c640 = arith.constant 640 : index
    %c0_13 = arith.constant 0 : index
    %24 = vector.load %arg2[%c640, %c0_13] : memref<1760x128xf32, #tpu.memory_space<vmem>>, vector<320x128xf32>
    %cst_14 = arith.constant dense<0.000000e+00> : vector<8x128xf32>
    %25 = tpu.matmul %23, %24, %cst_14 {dimension_numbers = #tpu.dot_dimension_numbers<[1], [0], [0], [1], [0, 0, 1, 1], [], []>} : vector<8x320xf32>, vector<320x128xf32>, vector<8x128xf32> -> vector<8x128xf32>
    %26 = arith.addf %22, %25 : vector<8x128xf32>
    %c960 = arith.constant 960 : index
    %c0_15 = arith.constant 0 : index
    %27 = vector.load %arg2[%c960, %c0_15] : memref<1760x128xf32, #tpu.memory_space<vmem>>, vector<1x128xf32>
    %28 = vector.broadcast %27 : vector<1x128xf32> to vector<8x128xf32>
    %29 = arith.addf %26, %28 : vector<8x128xf32>
    %cst_16 = arith.constant 0.000000e+00 : f32
    %30 = vector.broadcast %cst_16 : f32 to vector<8x128xf32>
    %31 = arith.maximumf %29, %30 : vector<8x128xf32>
    %32 = vector.extract_strided_slice %31 {offsets = [0, 0], sizes = [6, 128], strides = [1, 1]} : vector<8x128xf32> to vector<6x128xf32>
    %c968 = arith.constant 968 : index
    %c0_17 = arith.constant 0 : index
    %33 = vector.load %arg2[%c968, %c0_17] : memref<1760x128xf32, #tpu.memory_space<vmem>>, vector<128x128xf32>
    %cst_18 = arith.constant dense<0.000000e+00> : vector<6x128xf32>
    %34 = tpu.matmul %32, %33, %cst_18 {dimension_numbers = #tpu.dot_dimension_numbers<[1], [0], [0], [1], [0, 0, 1, 1], [], []>} : vector<6x128xf32>, vector<128x128xf32>, vector<6x128xf32> -> vector<6x128xf32>
    %35 = vector.extract_strided_slice %31 {offsets = [1, 0], sizes = [6, 128], strides = [1, 1]} : vector<8x128xf32> to vector<6x128xf32>
    %c1096 = arith.constant 1096 : index
    %c0_19 = arith.constant 0 : index
    %36 = vector.load %arg2[%c1096, %c0_19] : memref<1760x128xf32, #tpu.memory_space<vmem>>, vector<128x128xf32>
    %cst_20 = arith.constant dense<0.000000e+00> : vector<6x128xf32>
    %37 = tpu.matmul %35, %36, %cst_20 {dimension_numbers = #tpu.dot_dimension_numbers<[1], [0], [0], [1], [0, 0, 1, 1], [], []>} : vector<6x128xf32>, vector<128x128xf32>, vector<6x128xf32> -> vector<6x128xf32>
    %38 = arith.addf %34, %37 : vector<6x128xf32>
    %39 = vector.extract_strided_slice %31 {offsets = [2, 0], sizes = [6, 128], strides = [1, 1]} : vector<8x128xf32> to vector<6x128xf32>
    %c1224 = arith.constant 1224 : index
    %c0_21 = arith.constant 0 : index
    %40 = vector.load %arg2[%c1224, %c0_21] : memref<1760x128xf32, #tpu.memory_space<vmem>>, vector<128x128xf32>
    %cst_22 = arith.constant dense<0.000000e+00> : vector<6x128xf32>
    %41 = tpu.matmul %39, %40, %cst_22 {dimension_numbers = #tpu.dot_dimension_numbers<[1], [0], [0], [1], [0, 0, 1, 1], [], []>} : vector<6x128xf32>, vector<128x128xf32>, vector<6x128xf32> -> vector<6x128xf32>
    %42 = arith.addf %38, %41 : vector<6x128xf32>
    %c1352 = arith.constant 1352 : index
    %c0_23 = arith.constant 0 : index
    %43 = vector.load %arg2[%c1352, %c0_23] : memref<1760x128xf32, #tpu.memory_space<vmem>>, vector<1x128xf32>
    %44 = vector.broadcast %43 : vector<1x128xf32> to vector<6x128xf32>
    %45 = arith.addf %42, %44 : vector<6x128xf32>
    %cst_24 = arith.constant 0.000000e+00 : f32
    %46 = vector.broadcast %cst_24 : f32 to vector<6x128xf32>
    %47 = arith.maximumf %45, %46 : vector<6x128xf32>
    %48 = vector.extract_strided_slice %47 {offsets = [0, 0], sizes = [4, 128], strides = [1, 1]} : vector<6x128xf32> to vector<4x128xf32>
    %c1360 = arith.constant 1360 : index
    %c0_25 = arith.constant 0 : index
    %49 = vector.load %arg2[%c1360, %c0_25] : memref<1760x128xf32, #tpu.memory_space<vmem>>, vector<128x128xf32>
    %cst_26 = arith.constant dense<0.000000e+00> : vector<4x128xf32>
    %50 = tpu.matmul %48, %49, %cst_26 {dimension_numbers = #tpu.dot_dimension_numbers<[1], [0], [0], [1], [0, 0, 1, 1], [], []>} : vector<4x128xf32>, vector<128x128xf32>, vector<4x128xf32> -> vector<4x128xf32>
    %51 = vector.extract_strided_slice %47 {offsets = [1, 0], sizes = [4, 128], strides = [1, 1]} : vector<6x128xf32> to vector<4x128xf32>
    %c1488 = arith.constant 1488 : index
    %c0_27 = arith.constant 0 : index
    %52 = vector.load %arg2[%c1488, %c0_27] : memref<1760x128xf32, #tpu.memory_space<vmem>>, vector<128x128xf32>
    %cst_28 = arith.constant dense<0.000000e+00> : vector<4x128xf32>
    %53 = tpu.matmul %51, %52, %cst_28 {dimension_numbers = #tpu.dot_dimension_numbers<[1], [0], [0], [1], [0, 0, 1, 1], [], []>} : vector<4x128xf32>, vector<128x128xf32>, vector<4x128xf32> -> vector<4x128xf32>
    %54 = arith.addf %50, %53 : vector<4x128xf32>
    %55 = vector.extract_strided_slice %47 {offsets = [2, 0], sizes = [4, 128], strides = [1, 1]} : vector<6x128xf32> to vector<4x128xf32>
    %c1616 = arith.constant 1616 : index
    %c0_29 = arith.constant 0 : index
    %56 = vector.load %arg2[%c1616, %c0_29] : memref<1760x128xf32, #tpu.memory_space<vmem>>, vector<128x128xf32>
    %cst_30 = arith.constant dense<0.000000e+00> : vector<4x128xf32>
    %57 = tpu.matmul %55, %56, %cst_30 {dimension_numbers = #tpu.dot_dimension_numbers<[1], [0], [0], [1], [0, 0, 1, 1], [], []>} : vector<4x128xf32>, vector<128x128xf32>, vector<4x128xf32> -> vector<4x128xf32>
    %58 = arith.addf %54, %57 : vector<4x128xf32>
    %c1744 = arith.constant 1744 : index
    %c0_31 = arith.constant 0 : index
    %59 = vector.load %arg2[%c1744, %c0_31] : memref<1760x128xf32, #tpu.memory_space<vmem>>, vector<1x128xf32>
    %60 = vector.broadcast %59 : vector<1x128xf32> to vector<4x128xf32>
    %61 = arith.addf %58, %60 : vector<4x128xf32>
    %cst_32 = arith.constant 0.000000e+00 : f32
    %62 = vector.broadcast %cst_32 : f32 to vector<4x128xf32>
    %63 = arith.maximumf %61, %62 : vector<4x128xf32>
    %c0_33 = arith.constant 0 : index
    %c0_34 = arith.constant 0 : index
    %64 = vector.load %arg1[%c0_33, %c0_34] : memref<168x512xf32, #tpu.memory_space<vmem>>, vector<128x512xf32>
    %cst_35 = arith.constant dense<0.000000e+00> : vector<4x512xf32>
    %65 = tpu.matmul %63, %64, %cst_35 {dimension_numbers = #tpu.dot_dimension_numbers<[1], [0], [0], [1], [0, 0, 1, 1], [], []>} : vector<4x128xf32>, vector<128x512xf32>, vector<4x512xf32> -> vector<4x512xf32>
    %c1752 = arith.constant 1752 : index
    %c0_36 = arith.constant 0 : index
    %66 = vector.load %arg2[%c1752, %c0_36] : memref<1760x128xf32, #tpu.memory_space<vmem>>, vector<1x128xf32>
    %67 = vector.extract_strided_slice %65 {offsets = [0, 0], sizes = [1, 128], strides = [1, 1]} : vector<4x512xf32> to vector<1x128xf32>
    %68 = arith.addf %66, %67 : vector<1x128xf32>
    %69 = vector.extract_strided_slice %65 {offsets = [1, 128], sizes = [1, 128], strides = [1, 1]} : vector<4x512xf32> to vector<1x128xf32>
    %70 = arith.addf %68, %69 : vector<1x128xf32>
    %71 = vector.extract_strided_slice %65 {offsets = [2, 256], sizes = [1, 128], strides = [1, 1]} : vector<4x512xf32> to vector<1x128xf32>
    %72 = arith.addf %70, %71 : vector<1x128xf32>
    %73 = vector.extract_strided_slice %65 {offsets = [3, 384], sizes = [1, 128], strides = [1, 1]} : vector<4x512xf32> to vector<1x128xf32>
    %74 = arith.addf %72, %73 : vector<1x128xf32>
    %c0_37 = arith.constant 0 : index
    %c0_38 = arith.constant 0 : index
    %75 = vector.load %arg3[%c0_37, %c0_38] : memref<1x128xf32, #tpu.memory_space<vmem>>, vector<1x128xf32>
    tpu.vector_store %arg3[%c0_37, %c0_38], %74 {strides = array<i32>} : memref<1x128xf32, #tpu.memory_space<vmem>>, vector<1x128xf32>,
    return
  }
}

</mosaic_0001>

<bundles_post_ra>
// kernel: object_model_forward.1
= control target key start
LH: loop header
LB: loop body
LE: loop exit
PB: predicated region body
PF: predicated region fallthrough
CT: control target
= control target key end

     0   :  { %8 = vsyncpa [#allocation3], 0  ;;  %s2673_s0 = inlined_call_operand.vmem [shape: s32[2,10,10], index: 0, kind: input, shape index: {}]   ;;  %s2674_s1 = inlined_call_operand.hbm [shape: f32[168,512], index: 1, kind: input, shape index: {}]   ;;  %s2675_s2 = inlined_call_operand.hbm [shape: f32[1760,128], index: 2, kind: input, shape index: {}]   ;;  %s2676_s3 = inlined_call_operand.vmem [shape: f32[1,128], index: 3, kind: output, shape index: {}]  }
   0x1   :  { %9 = vsyncpa [#allocation5], 0  ;;  %s2395_s12 = smov [#allocation2]  }
   0x2   :  { %s17_s13 = sshll.u32 %s2395_s12, 4  ;;  %s18_s13 = int_to_ptr.vmem [resolvable:$true] %s17_s13 }
   0x3   :  { %s2359_s14 = scalar_lea.vmem %s18_s13, 10752  ;;  %p2364_p1 = scmp.lt.s32.totalorder %s18_s13, %s18_s13 }
   0x4   :  { %p2360_p0 = scmp.ne.s32.totalorder %s18_s13, %s2359_s14  ;;  %p2365_p2 = scmp.lt.s32.totalorder %s2359_s14, %s2359_s14 }
   0x6   :  { %p2366_p3 = por %p2365_p2, %p2364_p1 }
   0x8   :  { %p2367_p4 = pnand %p2366_p3, %p2360_p0 }
   0xa   :  { %2370 = shalt.err (!%p2367_p4)
}
   0xb   :  { %s2396_s15 = smov 512   ;;  %s2397_s16 = smov 32  }
   0xc   :  { %23 = dma.hbm_to_vmem [thread:$0]  %s2674_s1, 10752, %s18_s13, [#allocation3], %s2396_s15, %s2396_s15, %s2397_s16  }
   0xd   :  { %s2398_s19 = smov [#allocation4]  }
   0xe   :  { %s29_s20 = sshll.u32 %s2398_s19, 4  ;;  %s30_s20 = int_to_ptr.vmem [resolvable:$true] %s29_s20 }
   0xf   :  { %s2379_s21 = scalar_lea.vmem %s30_s20, 28160  ;;  %p2384_p6 = scmp.lt.s32.totalorder %s30_s20, %s30_s20 }
  0x10   :  { %p2380_p5 = scmp.ne.s32.totalorder %s30_s20, %s2379_s21  ;;  %p2385_p7 = scmp.lt.s32.totalorder %s2379_s21, %s2379_s21 }
  0x12   :  { %p2386_p8 = por %p2385_p7, %p2384_p6 }
  0x14   :  { %p2387_p9 = pnand %p2386_p8, %p2380_p5 }
  0x16   :  { %2390 = shalt.err (!%p2387_p9)
}
  0x17   :  { %s2399_s22 = smov 128   ;;  %s2400_s23 = smov 8  }
  0x18   :  { %35 = dma.hbm_to_vmem [thread:$0]  %s2675_s2, 28160, %s30_s20, [#allocation5], %s2399_s22, %s2399_s22, %s2400_s23  }
  0x19   :  { %2391 = dma.done.wait [#allocation3], 10752  }
  0x1a   :  { %2392 = vsyncadd [#allocation3], 4294956544 }
  0x1b   :  { %2393 = dma.done.wait [#allocation5], 28160  }
  0x1c   :  { %2394 = vsyncadd [#allocation5], 4294939136  ;;  %v2401_v0 = vmov 0.0   ;;  %vm70_vm0 = vcmask 1041408   ;;  %v61_v1 = vld [vmem:[#allocation2 + $0x268] sm:$0x3]  ;;  %v402_v62 = vlaneseq }
  0x1d   :  { %144 = vmatprep.mubr.f32.mxu0 %v2401_v0  ;;  %311 = vmatprep.mubr.f32.mxu1 %v2401_v0  ;;  %v50_v2 = vld [vmem:[#allocation2 + $0x228] sm:$0x3]  ;;  %v60_v3 = vld [vmem:[#allocation2 + $0x260] sm:$0x3]  ;;  %v1789_v9 = vld [vmem:[%s2673_s0 + $0x10] sm:$0xff]  ;;  %vm63_vm1 = vcmask 80896  }
  0x1e   :  { %1791 = vmatprep.subr.msk.mxu0 %vm70_vm0, %v61_v1  ;;  %1798 = vmatprep.subr.msk.mxu1 %vm70_vm0, %v50_v2  ;;  %v49_v4 = vld [vmem:[#allocation2 + $0x220] sm:$0x3]  ;;  %v58_v5 = vld [vmem:[#allocation2 + $0x248] sm:$0xff]  ;;  %v55_v10 = vcvt.s32.f32 %v1789_v9  ;;  %v62_v11 = vld [vmem:[#allocation2 + $0x270] sm:$0x3]  ;;  %vm2402_vm2 = vmmov 0  }
  0x1f   :  { %v47_v6 = vld [vmem:[#allocation2 + $0x208] sm:$0xff]  ;;  %1792 = vmatpush1.msk.msra.mxu0 %vm70_vm0, %v60_v3  ;;  %1799 = vmatpush1.msk.msra.mxu1 %vm70_vm0, %v49_v4  ;;  %v57_v7 = vld [vmem:[#allocation2 + $0x240] sm:$0xff]  ;;  %v1790_v13 = vld [vmem:[%s2673_s0 + $0x18] sm:$0x3]  ;;  %v403_v63 = vshrl.u32 %v402_v62, 7  ;;  %vm521_vm7 = vcmask 1046528  }
  0x20   :  { %v46_v8 = vld [vmem:[#allocation2 + $0x200] sm:$0xff]  ;;  %110 = vmatprep.subr.mxu0 %v58_v5  ;;  %277 = vmatprep.subr.mxu1 %v47_v6  ;;  %v43_v15 = vld [vmem:[%s2673_s0 + $0x8] sm:$0x3]  ;;  %v56_v16 = vcvt.s32.f32 %v1790_v13  ;;  %v59_v17 = vld [vmem:[#allocation2 + $0x250] sm:$0xff]  ;;  %vm533_vm10 = vcmask 523264   ;;  %vm858_vm11 = vcmask 1045504  }
  0x21   :  { %v42_v12 = vld [vmem:[%s2673_s0] sm:$0xff]  ;;  %111 = vmatpush1.msra.mxu0 %v57_v7  ;;  %278 = vmatpush1.msra.mxu1 %v46_v8  ;;  %v506_v18 = vld [vmem:[#allocation4 + $0x238] sm:$0xff]  ;;  %v45_v19 = vcvt.s32.f32 %v43_v15  ;;  %v51_v21 = vld [vmem:[#allocation2 + $0x230] sm:$0x3]  ;;  %v408_v1 = vsub.s32 1, %v403_v63  ;;  %v404_v2 = vsub.s32 0, %v403_v63 }
  0x22   :  { %v44_v14 = vcvt.s32.f32 %v42_v12  ;;  %1793 = vmatmul.mubr.msk.f32.vlgmr.msra.gmra.mxu0 %vm63_vm1, %v55_v10  ;;  %2061 = vmatprep.subr.msk.mxu0 %vm70_vm0, %v62_v11  ;;  %v490_v20 = vld [vmem:[#allocation4 + $0x1b8] sm:$0xff]  ;;  %v505_v22 = vld [vmem:[#allocation4 + $0x230] sm:$0xff]  ;;  %v504_v25 = vld [vmem:[#allocation4 + $0x228] sm:$0xff] }
  0x23   :  { %2062 = vmatpush3.msk.msra.mxu0 %vm70_vm0, %v62_v11  ;;  %150 = vmatprep.mubr.f32.mxu0 %v2401_v0  ;;  %v489_v23 = vld [vmem:[#allocation4 + $0x1b0] sm:$0xff]  ;;  %v488_v26 = vld [vmem:[#allocation4 + $0x1a8] sm:$0xff]  ;;  %v503_v27 = vld [vmem:[#allocation4 + $0x220] sm:$0xff] }
  0x24   :  { %1800 = vmatmul.mubr.msk.f32.vlgmr.msra.gmra.mxu1 %vm63_vm1, %v44_v14  ;;  %2063 = vmatprep.subr.mxu0 %v59_v17  ;;  %v48_v24 = vld [vmem:[#allocation2 + $0x210] sm:$0xff]  ;;  %v487_v28 = vld [vmem:[#allocation4 + $0x1a0] sm:$0xff]  ;;  %v502_v29 = vld [vmem:[#allocation4 + $0x218] sm:$0xff] }
  0x25   :  { %317 = vmatprep.mubr.f32.mxu1 %v2401_v0  ;;  %1827 = vmatprep.subr.mxu1 %v506_v18  ;;  %v486_v30 = vld [vmem:[#allocation4 + $0x198] sm:$0xff]  ;;  %v501_v31 = vld [vmem:[#allocation4 + $0x210] sm:$0xff]  ;;  %v500_v33 = vld [vmem:[#allocation4 + $0x208] sm:$0xff] }
  0x26   :  { %1794 = vmatmul.mubr.msk.f32.gmra.mxu0 %vm63_vm1, %v56_v16  ;;  %1828 = vmatpush3.msra.mxu1 %v490_v20  ;;  %v485_v32 = vld [vmem:[#allocation4 + $0x190] sm:$0xff]  ;;  %v484_v34 = vld [vmem:[#allocation4 + $0x188] sm:$0xff]  ;;  %v499_v35 = vld [vmem:[#allocation4 + $0x200] sm:$0xff] }
  0x27   :  { %2064 = vmatpush3.msra.mxu0 %v59_v17  ;;  %2065 = vmatprep.mubr.msk.f32.mxu0 %vm63_vm1, %v55_v10  ;;  %v483_v36 = vld [vmem:[#allocation4 + $0x180] sm:$0xff]  ;;  %v498_v37 = vld [vmem:[#allocation4 + $0x1f8] sm:$0xff]  ;;  %v497_v39 = vld [vmem:[#allocation4 + $0x1f0] sm:$0xff]  ;;  %v412_v17 = vsub.s32 2, %v403_v63 }
  0x28   :  { %1801 = vmatmul.mubr.msk.f32.gmra.mxu1 %vm63_vm1, %v45_v19  ;;  %2068 = vmatprep.subr.msk.mxu0 %vm70_vm0, %v51_v21  ;;  %v482_v38 = vld [vmem:[#allocation4 + $0x178] sm:$0xff]  ;;  %v481_v40 = vld [vmem:[#allocation4 + $0x170] sm:$0xff]  ;;  %v496_v41 = vld [vmem:[#allocation4 + $0x1e8] sm:$0xff] }
  0x29   :  { %1829 = vmatprep.subr.mxu1 %v505_v22  ;;  %v480_v42 = vld [vmem:[#allocation4 + $0x168] sm:$0xff]  ;;  %v495_v43 = vld [vmem:[#allocation4 + $0x1e0] sm:$0xff]  ;;  %v494_v45 = vld [vmem:[#allocation4 + $0x1d8] sm:$0xff] }
  0x2a   :  { %2066 = vmatmul.mubr.msk.f32.vlgmr.msra.gmra.mxu0 %vm63_vm1, %v56_v16  ;;  %1830 = vmatpush3.msra.mxu1 %v489_v23  ;;  %v479_v44 = vld [vmem:[#allocation4 + $0x160] sm:$0xff]  ;;  %v514_v46 = vld [vmem:[#allocation4 + $0x278] sm:$0xff]  ;;  %v493_v48 = vld [vmem:[#allocation4 + $0x1d0] sm:$0xff] }
  0x2b   :  { %2069 = vmatpush3.msk.msra.mxu0 %vm70_vm0, %v51_v21  ;;  %2072 = vmatprep.mubr.msk.f32.mxu0 %vm63_vm1, %v44_v14  ;;  %v478_v47 = vld [vmem:[#allocation4 + $0x158] sm:$0xff]  ;;  %v513_v49 = vld [vmem:[#allocation4 + $0x270] sm:$0xff]  ;;  %v492_v51 = vld [vmem:[#allocation4 + $0x1c8] sm:$0xff] }
  0x2c   :  { %2070 = vmatprep.subr.mxu0 %v48_v24  ;;  %1831 = vmatprep.subr.mxu1 %v504_v25  ;;  %v477_v50 = vld [vmem:[#allocation4 + $0x150] sm:$0xff]  ;;  %v512_v52 = vld [vmem:[#allocation4 + $0x268] sm:$0xff]  ;;  %v491_v54 = vld [vmem:[#allocation4 + $0x1c0] sm:$0xff] }
  0x2d   :  { %2071 = vmatpush3.msra.mxu0 %v48_v24  ;;  %1832 = vmatpush3.msra.mxu1 %v488_v26  ;;  %v476_v53 = vld [vmem:[#allocation4 + $0x148] sm:$0xff]  ;;  %v511_v55 = vld [vmem:[#allocation4 + $0x260] sm:$0xff]  ;;  %v510_v57 = vld [vmem:[#allocation4 + $0x258] sm:$0xff] }
  0x2e   :  { %2073 = vmatmul.mubr.msk.f32.vlgmr.msra.gmra.mxu0 %vm63_vm1, %v45_v19  ;;  %1833 = vmatprep.subr.mxu1 %v503_v27  ;;  %v475_v56 = vld [vmem:[#allocation4 + $0x140] sm:$0xff]  ;;  %v509_v58 = vld [vmem:[#allocation4 + $0x250] sm:$0xff]  ;;  %v508_v59 = vld [vmem:[#allocation4 + $0x248] sm:$0xff] }
  0x2f   :  { %1834 = vmatpush3.msra.mxu1 %v487_v28  ;;  %2075 = vmatprep.subr.mxu0 %v2401_v0  ;;  %v507_v60 = vld [vmem:[#allocation4 + $0x240] sm:$0xff]  ;;  %v466_v61 = vld [vmem:[#allocation4 + $0xf8] sm:$0xff] }
  0x30   :  { %1835 = vmatprep.subr.mxu1 %v502_v29  ;;  %2076 = vmatpush3.msra.mxu0 %v514_v46  ;;  %v400_v4 = vld [vmem:[#allocation2 + $0x280] ss:$8 sm:$0x7]  ;;  %v833_v63 = vld [vmem:[#allocation4 + $0x2f8] sm:$0xff] }
  0x31   :  { %1836 = vmatpush3.msra.mxu1 %v486_v30  ;;  %2077 = vmatprep.subr.mxu0 %v2401_v0  ;;  %v2473_v7 = vrot.slane %v400_v4, %v408_v1  ;;  %v2477_v9 = vrot.slane %v400_v4, %v404_v2  ;;  %v413_v26 = vrot.slane %v400_v4, %v412_v17  ;;  %v465_v46 = vld [vmem:[#allocation4 + $0xf0] sm:$0xff]  ;;  %v460_v4 = vld [vmem:[#allocation4 + $0xc8] sm:$0xff]  ;;  %v845_v17 = vld [vmem:[#allocation4 + $0x358] sm:$0xff] }
  0x32   :  { %1837 = vmatprep.subr.mxu1 %v501_v31  ;;  %2078 = vmatpush3.msra.mxu0 %v513_v49  ;;  %v464_v49 = vld [vmem:[#allocation4 + $0xe8] sm:$0xff]  ;;  %v445_v1 = vld [vmem:[#allocation4 + $0x50] sm:$0xff] }
  0x33   :  { %1838 = vmatpush3.msra.mxu1 %v485_v32  ;;  %2079 = vmatprep.subr.mxu0 %v2401_v0  ;;  %v848_v2 = vld [vmem:[#allocation4 + $0x370] sm:$0xff] }
  0x34   :  { %1839 = vmatprep.subr.mxu1 %v500_v33  ;;  %2080 = vmatpush3.msra.mxu0 %v512_v52  ;;  %v448_v52 = vld [vmem:[#allocation4 + $0x68] sm:$0xff] }
  0x35   :  { %1840 = vmatpush3.msra.mxu1 %v484_v34  ;;  %2081 = vmatprep.subr.mxu0 %v2401_v0  ;;  %v474_v34 = vld [vmem:[#allocation4 + $0x138] sm:$0xff] }
  0x36   :  { %1841 = vmatprep.subr.mxu1 %v499_v35  ;;  %2082 = vmatpush3.msra.mxu0 %v511_v55  ;;  %v447_v55 = vld [vmem:[#allocation4 + $0x60] sm:$0xff] }
  0x37   :  { %1842 = vmatpush3.msra.mxu1 %v483_v36  ;;  %2083 = vmatprep.subr.mxu0 %v2401_v0 }
  0x38   :  { %1843 = vmatprep.subr.mxu1 %v498_v37  ;;  %2084 = vmatpush3.msra.mxu0 %v510_v57  ;;  %v467_v57 = vld [vmem:[#allocation4 + $0x100] sm:$0xff] }
  0x39   :  { %1844 = vmatpush3.msra.mxu1 %v482_v38  ;;  %2085 = vmatprep.subr.mxu0 %v2401_v0  ;;  %v473_v38 = vld [vmem:[#allocation4 + $0x130] sm:$0xff] }
  0x3a   :  { %1845 = vmatprep.subr.mxu1 %v497_v39  ;;  %2086 = vmatpush3.msra.mxu0 %v509_v58 }
  0x3b   :  { %1846 = vmatpush3.msra.mxu1 %v481_v40  ;;  %2087 = vmatprep.subr.mxu0 %v2401_v0  ;;  %v472_v40 = vld [vmem:[#allocation4 + $0x128] sm:$0xff] }
  0x3c   :  { %1847 = vmatprep.subr.mxu1 %v496_v41  ;;  %2088 = vmatpush3.msra.mxu0 %v508_v59  ;;  %v446_v59 = vld [vmem:[#allocation4 + $0x58] sm:$0xff] }
  0x3d   :  { %1848 = vmatpush3.msra.mxu1 %v480_v42  ;;  %2089 = vmatprep.subr.mxu0 %v2401_v0 }
  0x3e   :  { %1849 = vmatprep.subr.mxu1 %v495_v43  ;;  %2090 = vmatpush3.msra.mxu0 %v507_v60  ;;  %v471_v43 = vld [vmem:[#allocation4 + $0x120] sm:$0xff]  ;;  %v849_v60 = vld [vmem:[#allocation4 + $0x378] sm:$0xff] }
  0x3f   :  { %1850 = vmatpush3.msra.mxu1 %v479_v44  ;;  %2091 = vmatprep.mubr.msk.f32.mxu0 %vm2402_vm2, %v2401_v0  ;;  %v450_v44 = vld [vmem:[#allocation4 + $0x78] sm:$0xff] }
  0x40   :  { %1851 = vmatprep.subr.mxu1 %v494_v45  ;;  %1871 = vmatprep.subr.mxu0 %v466_v61  ;;  %v461_v61 = vld [vmem:[#allocation4 + $0xd0] sm:$0xff] }
  0x41   :  { %1852 = vmatpush3.msra.mxu1 %v478_v47  ;;  %v470_v47 = vld [vmem:[#allocation4 + $0x118] sm:$0xff] }
  0x42   :  { %1853 = vmatprep.subr.mxu1 %v493_v48  ;;  %v449_v48 = vld [vmem:[#allocation4 + $0x70] sm:$0xff] }
  0x43   :  { %1854 = vmatpush3.msra.mxu1 %v477_v50  ;;  %v469_v50 = vld [vmem:[#allocation4 + $0x110] sm:$0xff] }
  0x44   :  { %1855 = vmatprep.subr.mxu1 %v492_v51  ;;  %v2403_v51 = vmov 1.0  }
  0x45   :  { %1856 = vmatpush3.msra.mxu1 %v476_v53  ;;  %v463_v53 = vld [vmem:[#allocation4 + $0xe0] sm:$0xff] }
  0x46   :  { %1857 = vmatprep.subr.mxu1 %v491_v54  ;;  %v468_v54 = vld [vmem:[#allocation4 + $0x108] sm:$0xff] }
  0x47   :  { %1858 = vmatpush3.msra.mxu1 %v475_v56  ;;  %v462_v56 = vld [vmem:[#allocation4 + $0xd8] sm:$0xff] }
  0x48   :  { %2094 = vmatprep.subr.mxu1 %v2401_v0 }
  0xe2   :  { %v146_v3 = vpop.f32.mrf.mxu0 }
  0xe4   :  { %v313_v5 = vpop.f32.mrf.mxu1  ;;  %v148_v6 = vpop.f32.mrf.mxu0 }
  0xe5   :  { %v2475_v8 = vadd.f32 %v313_v5, %v146_v3  ;;  %v832_v5 = vld [vmem:[#allocation4 + $0x2f0] sm:$0xff] }
  0xe6   :  { %v315_v10 = vpop.f32.mrf.mxu1  ;;  %v152_v12 = vpop.f32.mrf.mxu0 }
  0xe7   :  { %v2479_v11 = vadd.f32 %v315_v10, %v148_v6  ;;  %vm417_vm4 = vcmp.eq.f32.partialorder %v2475_v8, %v2477_v9  ;;  %v444_v6 = vld [vmem:[#allocation4 + $0x48] sm:$0xff]  ;;  %v459_v10 = vld [vmem:[#allocation4 + $0xc0] sm:$0xff] }
  0xe8   :  { %v319_v13 = vpop.f32.mrf.mxu1  ;;  %v154_v15 = vpop.f32.mrf.mxu0  ;;  %v2499_v22 = vsel %vm417_vm4, 1.0, %v2401_v0  ;;  %v834_v8 = vld [vmem:[#allocation4 + $0x300] sm:$0xff] }
  0xe9   :  { %vm418_vm3 = vcmp.eq.f32.partialorder %v2479_v11, %v2473_v7  ;;  %v320_v14 = vadd.f32 %v319_v13, %v152_v12  ;;  %v522_v30 = vrot.slane %v2499_v22, 1  ;;  %v831_v11 = vld [vmem:[#allocation4 + $0x2e8] sm:$0xff]  ;;  %v443_v12 = vld [vmem:[#allocation4 + $0x40] sm:$0xff] }
  0xea   :  { %v321_v16 = vpop.f32.mrf.mxu1  ;;  %v2067_v19 = vpop.f32.mrf.mxu0  ;;  %v2490_v20 = vsel %vm418_vm3, 1.0, %v2401_v0  ;;  %v846_v13 = vld [vmem:[#allocation4 + $0x360] sm:$0xff] }
  0xeb   :  { %vm420_vm5 = vcmp.eq.f32.partialorder %v320_v14, %v2477_v9  ;;  %v322_v18 = vadd.f32 %v321_v16, %v154_v15  ;;  %v525_v27 = vrot.slane %v2490_v20, 1  ;;  %v862_v62 = vrot.slane %v2490_v20, 2  ;;  %v458_v14 = vld [vmem:[#allocation4 + $0xb8] sm:$0xff]  ;;  %v830_v15 = vld [vmem:[#allocation4 + $0x2e0] sm:$0xff]  ;;  %v441_v20 = vld [vmem:[#allocation4 + $0x30] sm:$0xff] }
  0xec   :  { %v2493_v21 = vsel %vm420_vm5, 1.0, %v2401_v0  ;;  %v223_v23 = vpop.f32.mrf.mxu0  ;;  %v442_v16 = vld [vmem:[#allocation4 + $0x38] sm:$0xff]  ;;  %v854_v9 = vld [vmem:[#allocation4 + $0x3a0] sm:$0xff] }
  0xed   :  { %vm421_vm6 = vcmp.eq.f32.partialorder %v322_v18, %v2473_v7  ;;  %v523_v24 = vrot.slane %v2493_v21, 1  ;;  %v847_v7 = vld [vmem:[#allocation4 + $0x368] sm:$0xff]  ;;  %v457_v18 = vld [vmem:[#allocation4 + $0xb0] sm:$0xff] }
  0xee   :  { %v2504_v25 = vsel %vm421_vm6, 1.0, %v2401_v0  ;;  %v2074_v29 = vpop.f32.mrf.mxu0 }
  0xef   :  { %v526_v28 = vrot.slane %v2504_v25, 1  ;;  %v396_v31 = vadd.f32 %v2074_v29, %v2067_v19  ;;  %v524_v36 = vsel %vm521_vm7, %v522_v30, %v523_v24  ;;  %v863_v58 = vrot.slane %v2504_v25, 2  ;;  %v829_v19 = vld [vmem:[#allocation4 + $0x2d8] sm:$0xff]  ;;  %v456_v24 = vld [vmem:[#allocation4 + $0xa8] sm:$0xff]  ;;  %v828_v25 = vld [vmem:[#allocation4 + $0x2d0] sm:$0xff] }
  0xf0   :  { %v390_v32 = vpop.f32.mrf.mxu0  ;;  %v827_v29 = vld [vmem:[#allocation4 + $0x2c8] sm:$0xff]  ;;  %v439_v30 = vld [vmem:[#allocation4 + $0x20] sm:$0xff] }
  0xf1   :  { %v527_v33 = vsel %vm521_vm7, %v525_v27, %v526_v28  ;;  %vm422_vm8 = vcmp.eq.f32.partialorder %v396_v31, %v413_v26  ;;  %v391_v35 = vadd.f32 %v390_v32, %v223_v23  ;;  %v864_v3 = vsel %vm858_vm11, %v862_v62, %v863_v58  ;;  %v844_v23 = vld [vmem:[#allocation4 + $0x350] sm:$0xff]  ;;  %v843_v27 = vld [vmem:[#allocation4 + $0x348] sm:$0xff]  ;;  %v455_v28 = vld [vmem:[#allocation4 + $0xa0] sm:$0xff] }
  0xf2   :  { %600 = vmatprep.mubr.f32.mxu1 %v527_v33  ;;  %v2512_v37 = vsel %vm422_vm8, 1.0, %v2401_v0  ;;  %v842_v31 = vld [vmem:[#allocation4 + $0x340] sm:$0xff]  ;;  %v454_v32 = vld [vmem:[#allocation4 + $0x98] sm:$0xff]  ;;  %v835_v58 = vld [vmem:[#allocation4 + $0x308] sm:$0xff]  ;;  %v859_v62 = vrot.slane %v2499_v22, 2 }
  0xf3   :  { %601 = vmatmul.mubr.f32.vlgmr.msra.gmra.mxu1 %v524_v36  ;;  %vm419_vm9 = vcmp.eq.f32.partialorder %v391_v35, %v413_v26  ;;  %v529_v41 = vrot.slane %v2512_v37, 1  ;;  %v440_v26 = vld [vmem:[#allocation4 + $0x28] sm:$0xff]  ;;  %v826_v33 = vld [vmem:[#allocation4 + $0x2c0] sm:$0xff]  ;;  %v841_v35 = vld [vmem:[#allocation4 + $0x338] sm:$0xff] }
  0xf4   :  { %2095 = vmatpush3.msra.mxu1 %v474_v34  ;;  %2110 = vmatprep.mubr.msk.f32.mxu1 %vm2402_vm2, %v2401_v0  ;;  %v2517_v39 = vsel %vm419_vm9, 1.0, %v2401_v0  ;;  %v438_v34 = vld [vmem:[#allocation4 + $0x18] sm:$0xff]  ;;  %v453_v36 = vld [vmem:[#allocation4 + $0x90] sm:$0xff]  ;;  %v851_v22 = vld [vmem:[#allocation4 + $0x388] sm:$0xff] }
  0xf5   :  { %2096 = vmatprep.subr.mxu1 %v2401_v0  ;;  %v528_v42 = vrot.slane %v2517_v39, 1 }
  0xf6   :  { %2097 = vmatpush3.msra.mxu1 %v473_v38  ;;  %v825_v38 = vld [vmem:[#allocation4 + $0x2b8] sm:$0xff] }
  0xf7   :  { %2098 = vmatprep.subr.mxu1 %v2401_v0  ;;  %v530_v45 = vsel %vm521_vm7, %v528_v42, %v529_v41  ;;  %v840_v41 = vld [vmem:[#allocation4 + $0x330] sm:$0xff]  ;;  %v452_v42 = vld [vmem:[#allocation4 + $0x88] sm:$0xff] }
  0xf8   :  { %2099 = vmatpush3.msra.mxu1 %v472_v40  ;;  %2092 = vmatmul.mubr.msk.f32.vlgmr.msra.gmra.mxu0 %vm533_vm10, %v530_v45  ;;  %v437_v40 = vld [vmem:[#allocation4 + $0x10] sm:$0xff]  ;;  %v839_v45 = vld [vmem:[#allocation4 + $0x328] sm:$0xff] }
  0xf9   :  { %2100 = vmatprep.subr.mxu1 %v2401_v0  ;;  %1872 = vmatpush3.msra.mxu0 %v450_v44  ;;  %v436_v44 = vld [vmem:[#allocation4 + $0x8] sm:$0xff] }
  0xfa   :  { %2101 = vmatpush3.msra.mxu1 %v471_v43  ;;  %1873 = vmatprep.subr.mxu0 %v465_v46  ;;  %v824_v43 = vld [vmem:[#allocation4 + $0x2b0] sm:$0xff]  ;;  %v451_v46 = vld [vmem:[#allocation4 + $0x80] sm:$0xff] }
  0xfb   :  { %2102 = vmatprep.subr.mxu1 %v2401_v0  ;;  %1812 = vmatprep.mubr.msk.f32.mxu0 %vm418_vm3, %v2403_v51 }
  0xfc   :  { %2103 = vmatpush3.msra.mxu1 %v470_v47  ;;  %1874 = vmatpush3.msra.mxu0 %v449_v48  ;;  %v823_v47 = vld [vmem:[#allocation4 + $0x2a8] sm:$0xff]  ;;  %v435_v48 = vld [vmem:[#allocation4] sm:$0xff] }
  0xfd   :  { %2104 = vmatprep.subr.mxu1 %v2401_v0  ;;  %1875 = vmatprep.subr.mxu0 %v464_v49  ;;  %v838_v49 = vld [vmem:[#allocation4 + $0x320] sm:$0xff] }
  0xfe   :  { %2105 = vmatpush3.msra.mxu1 %v469_v50  ;;  %1876 = vmatpush3.msra.mxu0 %v448_v52  ;;  %v822_v50 = vld [vmem:[#allocation4 + $0x2a0] sm:$0xff]  ;;  %v837_v52 = vld [vmem:[#allocation4 + $0x318] sm:$0xff] }
  0xff   :  { %2106 = vmatprep.subr.mxu1 %v2401_v0  ;;  %1877 = vmatprep.subr.mxu0 %v463_v53  ;;  %v857_v53 = vld [vmem:[#allocation4 + $0x3b8] sm:$0xff] }
 0x100   :  { %2107 = vmatpush3.msra.mxu1 %v468_v54  ;;  %1878 = vmatpush3.msra.mxu0 %v447_v55  ;;  %v821_v54 = vld [vmem:[#allocation4 + $0x298] sm:$0xff]  ;;  %v836_v55 = vld [vmem:[#allocation4 + $0x310] sm:$0xff] }
 0x101   :  { %2108 = vmatprep.subr.mxu1 %v2401_v0  ;;  %1879 = vmatprep.subr.mxu0 %v462_v56  ;;  %v856_v56 = vld [vmem:[#allocation4 + $0x3b0] sm:$0xff] }
 0x102   :  { %2109 = vmatpush3.msra.mxu1 %v467_v57  ;;  %1880 = vmatpush3.msra.mxu0 %v446_v59  ;;  %v820_v57 = vld [vmem:[#allocation4 + $0x290] sm:$0xff]  ;;  %v855_v59 = vld [vmem:[#allocation4 + $0x3a8] sm:$0xff] }
 0x103   :  { %2111 = vmatmul.mubr.msk.f32.vlgmr.msra.gmra.mxu1 %vm533_vm10, %v2517_v39  ;;  %1915 = vmatprep.subr.mxu1 %v849_v60  ;;  %v819_v60 = vld [vmem:[#allocation4 + $0x288] sm:$0xff] }
 0x104   :  { %1881 = vmatprep.subr.mxu0 %v461_v61  ;;  %1916 = vmatpush3.msra.mxu1 %v833_v63  ;;  %v860_v61 = vrot.slane %v2493_v21, 2  ;;  %v853_v63 = vld [vmem:[#allocation4 + $0x398] sm:$0xff] }
 0x105   :  { %936 = vmatprep.mubr.f32.mxu1 %v864_v3  ;;  %1882 = vmatpush3.msra.mxu0 %v445_v1  ;;  %v852_v1 = vld [vmem:[#allocation4 + $0x390] sm:$0xff]  ;;  %v850_v3 = vld [vmem:[#allocation4 + $0x380] sm:$0xff] }
 0x106   :  { %1917 = vmatprep.subr.mxu1 %v848_v2  ;;  %1883 = vmatprep.subr.mxu0 %v460_v4  ;;  %v861_v21 = vsel %vm858_vm11, %v859_v62, %v860_v61  ;;  %v865_v2 = vrot.slane %v2517_v39, 2  ;;  %v866_v4 = vrot.slane %v2512_v37, 2  ;;  %v1035_v39 = vld [vmem:[#allocation4 + $0x440] sm:$0xff]  ;;  %v1033_v37 = vld [vmem:[#allocation4 + $0x430] sm:$0xff] }
 0x107   :  { %1918 = vmatpush3.msra.mxu1 %v832_v5  ;;  %1884 = vmatpush3.msra.mxu0 %v444_v6  ;;  %v1051_v6 = vld [vmem:[#allocation4 + $0x4c0] sm:$0xff] }
 0x108   :  { %1919 = vmatprep.subr.mxu1 %v847_v7  ;;  %1885 = vmatprep.subr.mxu0 %v459_v10  ;;  %v867_v5 = vsel %vm858_vm11, %v865_v2, %v866_v4  ;;  %v1034_v7 = vld [vmem:[#allocation4 + $0x438] sm:$0xff]  ;;  %v1816_v61 = vld [vmem:[#allocation4 + $0x3c0] ss:$0 sm:$0xff]  ;;  %v1207_v2 = vld [vmem:[#allocation4 + $0x528] sm:$0xff] }
 0x109   :  { %1920 = vmatpush3.msra.mxu1 %v831_v11  ;;  %1886 = vmatpush3.msra.mxu0 %v443_v12  ;;  %v1050_v10 = vld [vmem:[#allocation4 + $0x4b8] sm:$0xff]  ;;  %v1049_v11 = vld [vmem:[#allocation4 + $0x4b0] sm:$0xff]  ;;  %v1032_v12 = vld [vmem:[#allocation4 + $0x428] sm:$0xff] }
 0x10a   :  { %1921 = vmatprep.subr.mxu1 %v846_v13  ;;  %1887 = vmatprep.subr.mxu0 %v458_v14  ;;  %v1048_v13 = vld [vmem:[#allocation4 + $0x4a8] sm:$0xff]  ;;  %v1031_v14 = vld [vmem:[#allocation4 + $0x420] sm:$0xff]  ;;  %v1205_v4 = vld [vmem:[#allocation4 + $0x518] sm:$0xff] }
 0x10b   :  { %1922 = vmatpush3.msra.mxu1 %v830_v15  ;;  %1888 = vmatpush3.msra.mxu0 %v442_v16  ;;  %v1047_v15 = vld [vmem:[#allocation4 + $0x4a0] sm:$0xff]  ;;  %v1030_v16 = vld [vmem:[#allocation4 + $0x418] sm:$0xff] }
 0x10c   :  { %1923 = vmatprep.subr.mxu1 %v845_v17  ;;  %1889 = vmatprep.subr.mxu0 %v457_v18  ;;  %v1046_v17 = vld [vmem:[#allocation4 + $0x498] sm:$0xff]  ;;  %v1029_v18 = vld [vmem:[#allocation4 + $0x410] sm:$0xff] }
 0x10d   :  { %1924 = vmatpush3.msra.mxu1 %v829_v19  ;;  %1890 = vmatpush3.msra.mxu0 %v441_v20  ;;  %v1045_v19 = vld [vmem:[#allocation4 + $0x490] sm:$0xff]  ;;  %v1028_v20 = vld [vmem:[#allocation4 + $0x408] sm:$0xff] }
 0x10e   :  { %1925 = vmatprep.subr.mxu1 %v844_v23  ;;  %1891 = vmatprep.subr.mxu0 %v456_v24  ;;  %v1044_v23 = vld [vmem:[#allocation4 + $0x488] sm:$0xff]  ;;  %v1027_v24 = vld [vmem:[#allocation4 + $0x400] sm:$0xff] }
 0x10f   :  { %1926 = vmatpush3.msra.mxu1 %v828_v25  ;;  %1892 = vmatpush3.msra.mxu0 %v440_v26  ;;  %v1043_v25 = vld [vmem:[#allocation4 + $0x480] sm:$0xff]  ;;  %v1026_v26 = vld [vmem:[#allocation4 + $0x3f8] sm:$0xff] }
 0x110   :  { %1927 = vmatprep.subr.mxu1 %v843_v27  ;;  %1893 = vmatprep.subr.mxu0 %v455_v28  ;;  %v1042_v27 = vld [vmem:[#allocation4 + $0x478] sm:$0xff]  ;;  %v1025_v28 = vld [vmem:[#allocation4 + $0x3f0] sm:$0xff] }
 0x111   :  { %1928 = vmatpush3.msra.mxu1 %v827_v29  ;;  %1894 = vmatpush3.msra.mxu0 %v439_v30  ;;  %v1041_v29 = vld [vmem:[#allocation4 + $0x470] sm:$0xff]  ;;  %v1024_v30 = vld [vmem:[#allocation4 + $0x3e8] sm:$0xff] }
 0x112   :  { %1929 = vmatprep.subr.mxu1 %v842_v31  ;;  %1895 = vmatprep.subr.mxu0 %v454_v32  ;;  %v1040_v31 = vld [vmem:[#allocation4 + $0x468] sm:$0xff]  ;;  %v1023_v32 = vld [vmem:[#allocation4 + $0x3e0] sm:$0xff] }
 0x113   :  { %1930 = vmatpush3.msra.mxu1 %v826_v33  ;;  %1896 = vmatpush3.msra.mxu0 %v438_v34  ;;  %v1039_v33 = vld [vmem:[#allocation4 + $0x460] sm:$0xff]  ;;  %v1022_v34 = vld [vmem:[#allocation4 + $0x3d8] sm:$0xff] }
 0x114   :  { %1931 = vmatprep.subr.mxu1 %v841_v35  ;;  %1897 = vmatprep.subr.mxu0 %v453_v36  ;;  %v1038_v35 = vld [vmem:[#allocation4 + $0x458] sm:$0xff]  ;;  %v1021_v36 = vld [vmem:[#allocation4 + $0x3d0] sm:$0xff] }
 0x115   :  { %1932 = vmatpush3.msra.mxu1 %v825_v38  ;;  %1898 = vmatpush3.msra.mxu0 %v437_v40  ;;  %v1037_v38 = vld [vmem:[#allocation4 + $0x450] sm:$0xff]  ;;  %v1020_v40 = vld [vmem:[#allocation4 + $0x3c8] sm:$0xff] }
 0x116   :  { %1933 = vmatprep.subr.mxu1 %v840_v41  ;;  %1899 = vmatprep.subr.mxu0 %v452_v42  ;;  %v1036_v41 = vld [vmem:[#allocation4 + $0x448] sm:$0xff] }
 0x117   :  { %1934 = vmatpush3.msra.mxu1 %v824_v43  ;;  %1900 = vmatpush3.msra.mxu0 %v436_v44 }
 0x118   :  { %1935 = vmatprep.subr.mxu1 %v839_v45  ;;  %1901 = vmatprep.subr.mxu0 %v451_v46 }
 0x119   :  { %1936 = vmatpush3.msra.mxu1 %v823_v47  ;;  %1902 = vmatpush3.msra.mxu0 %v435_v48 }
 0x11a   :  { %1937 = vmatprep.subr.mxu1 %v838_v49  ;;  %1813 = vmatmul.mubr.msk.f32.vlgmr.msra.gmra.mxu0 %vm417_vm4, %v2403_v51  ;;  %v818_v51 = vld [vmem:[#allocation4 + $0x280] sm:$0xff] }
 0x11b   :  { %1938 = vmatpush3.msra.mxu1 %v822_v50  ;;  %2113 = vmatprep.subr.mxu0 %v2401_v0 }
 0x11c   :  { %1939 = vmatprep.subr.mxu1 %v837_v52  ;;  %2114 = vmatpush3.msra.mxu0 %v857_v53 }
 0x11d   :  { %1940 = vmatpush3.msra.mxu1 %v821_v54  ;;  %2115 = vmatprep.subr.mxu0 %v2401_v0 }
 0x11e   :  { %1941 = vmatprep.subr.mxu1 %v836_v55  ;;  %2116 = vmatpush3.msra.mxu0 %v856_v56 }
 0x11f   :  { %1942 = vmatpush3.msra.mxu1 %v820_v57  ;;  %2117 = vmatprep.subr.mxu0 %v2401_v0 }
 0x120   :  { %1943 = vmatprep.subr.mxu1 %v835_v58  ;;  %2118 = vmatpush3.msra.mxu0 %v855_v59 }
 0x121   :  { %1944 = vmatpush3.msra.mxu1 %v819_v60  ;;  %2119 = vmatprep.subr.mxu0 %v2401_v0 }
 0x122   :  { %1945 = vmatprep.subr.mxu1 %v834_v8  ;;  %2120 = vmatpush3.msra.mxu0 %v854_v9 }
 0x123   :  { %1946 = vmatpush3.msra.mxu1 %v818_v51  ;;  %2121 = vmatprep.subr.mxu0 %v2401_v0 }
 0x124   :  { %937 = vmatmul.mubr.f32.vlgmr.msra.gmra.mxu1 %v861_v21  ;;  %2122 = vmatpush3.msra.mxu0 %v853_v63  ;;  %v1210_v21 = vld [vmem:[#allocation4 + $0x540] sm:$0xff] }
 0x125   :  { %2129 = vmatprep.mubr.msk.f32.mxu0 %vm2402_vm2, %v2401_v0  ;;  %2123 = vmatprep.subr.mxu0 %v2401_v0 }
 0x126   :  { %2167 = vmatprep.subr.mxu1 %v2401_v0  ;;  %2124 = vmatpush3.msra.mxu0 %v852_v1  ;;  %v1209_v1 = vld [vmem:[#allocation4 + $0x538] sm:$0xff] }
 0x127   :  { %2199 = vmatprep.mubr.msk.f32.mxu1 %vm2402_vm2, %v2401_v0  ;;  %2125 = vmatprep.subr.mxu0 %v2401_v0 }
 0x128   :  { %2126 = vmatpush3.msra.mxu0 %v851_v22  ;;  %2168 = vmatpush3.msra.mxu1 %v1035_v39  ;;  %v1208_v22 = vld [vmem:[#allocation4 + $0x530] sm:$0xff]  ;;  %v1203_v39 = vld [vmem:[#allocation4 + $0x508] sm:$0xff] }
 0x129   :  { %2127 = vmatprep.subr.mxu0 %v2401_v0  ;;  %2169 = vmatprep.subr.mxu1 %v2401_v0 }
 0x12a   :  { %2128 = vmatpush3.msra.mxu0 %v850_v3  ;;  %2170 = vmatpush3.msra.mxu1 %v1034_v7  ;;  %v1206_v3 = vld [vmem:[#allocation4 + $0x520] sm:$0xff]  ;;  %v1201_v7 = vld [vmem:[#allocation4 + $0x4f8] sm:$0xff] }
 0x12b   :  { %2130 = vmatmul.mubr.msk.f32.vlgmr.msra.gmra.mxu0 %vm533_vm10, %v867_v5  ;;  %2132 = vmatprep.subr.mxu0 %v2401_v0  ;;  %v1204_v5 = vld [vmem:[#allocation4 + $0x510] sm:$0xff] }
 0x12c   :  { %2164 = vmatprep.mubr.msk.f32.mxu0 %vm2402_vm2, %v2401_v0  ;;  %2133 = vmatpush3.msra.mxu0 %v1051_v6  ;;  %v1202_v6 = vld [vmem:[#allocation4 + $0x500] sm:$0xff] }
 0x12d   :  { %2134 = vmatprep.subr.mxu0 %v2401_v0  ;;  %2171 = vmatprep.subr.mxu1 %v2401_v0 }
 0x12e   :  { %2135 = vmatpush3.msra.mxu0 %v1050_v10  ;;  %2172 = vmatpush3.msra.mxu1 %v1033_v37  ;;  %v1200_v10 = vld [vmem:[#allocation4 + $0x4f0] sm:$0xff]  ;;  %v1199_v37 = vld [vmem:[#allocation4 + $0x4e8] sm:$0xff] }
 0x12f   :  { %2136 = vmatprep.subr.mxu0 %v2401_v0  ;;  %2173 = vmatprep.subr.mxu1 %v2401_v0 }
 0x130   :  { %2137 = vmatpush3.msra.mxu0 %v1049_v11  ;;  %2174 = vmatpush3.msra.mxu1 %v1032_v12  ;;  %v1198_v11 = vld [vmem:[#allocation4 + $0x4e0] sm:$0xff]  ;;  %v1197_v12 = vld [vmem:[#allocation4 + $0x4d8] sm:$0xff] }
 0x131   :  { %2138 = vmatprep.subr.mxu0 %v2401_v0  ;;  %2175 = vmatprep.subr.mxu1 %v2401_v0 }
 0x132   :  { %2139 = vmatpush3.msra.mxu0 %v1048_v13  ;;  %2176 = vmatpush3.msra.mxu1 %v1031_v14  ;;  %v1196_v13 = vld [vmem:[#allocation4 + $0x4d0] sm:$0xff]  ;;  %v1195_v14 = vld [vmem:[#allocation4 + $0x4c8] sm:$0xff] }
 0x133   :  { %2140 = vmatprep.subr.mxu0 %v2401_v0  ;;  %2177 = vmatprep.subr.mxu1 %v2401_v0 }
 0x134   :  { %2141 = vmatpush3.msra.mxu0 %v1047_v15  ;;  %2178 = vmatpush3.msra.mxu1 %v1030_v16  ;;  %v1306_v16 = vld [vmem:[#allocation4 + $0x5c8] sm:$0xff] }
 0x135   :  { %2142 = vmatprep.subr.mxu0 %v2401_v0  ;;  %2179 = vmatprep.subr.mxu1 %v2401_v0 }
 0x136   :  { %2143 = vmatpush3.msra.mxu0 %v1046_v17  ;;  %2180 = vmatpush3.msra.mxu1 %v1029_v18  ;;  %v1322_v17 = vld [vmem:[#allocation4 + $0x648] sm:$0xff]  ;;  %v1305_v18 = vld [vmem:[#allocation4 + $0x5c0] sm:$0xff] }
 0x137   :  { %2144 = vmatprep.subr.mxu0 %v2401_v0  ;;  %2181 = vmatprep.subr.mxu1 %v2401_v0 }
 0x138   :  { %2145 = vmatpush3.msra.mxu0 %v1045_v19  ;;  %2182 = vmatpush3.msra.mxu1 %v1028_v20  ;;  %v1321_v19 = vld [vmem:[#allocation4 + $0x640] sm:$0xff]  ;;  %v1304_v20 = vld [vmem:[#allocation4 + $0x5b8] sm:$0xff] }
 0x139   :  { %2146 = vmatprep.subr.mxu0 %v2401_v0  ;;  %2183 = vmatprep.subr.mxu1 %v2401_v0 }
 0x13a   :  { %2147 = vmatpush3.msra.mxu0 %v1044_v23  ;;  %2184 = vmatpush3.msra.mxu1 %v1027_v24  ;;  %v1320_v23 = vld [vmem:[#allocation4 + $0x638] sm:$0xff]  ;;  %v1303_v24 = vld [vmem:[#allocation4 + $0x5b0] sm:$0xff] }
 0x13b   :  { %2148 = vmatprep.subr.mxu0 %v2401_v0  ;;  %2185 = vmatprep.subr.mxu1 %v2401_v0 }
 0x13c   :  { %2149 = vmatpush3.msra.mxu0 %v1043_v25  ;;  %2186 = vmatpush3.msra.mxu1 %v1026_v26  ;;  %v1319_v25 = vld [vmem:[#allocation4 + $0x630] sm:$0xff]  ;;  %v1302_v26 = vld [vmem:[#allocation4 + $0x5a8] sm:$0xff] }
 0x13d   :  { %2150 = vmatprep.subr.mxu0 %v2401_v0  ;;  %2187 = vmatprep.subr.mxu1 %v2401_v0 }
 0x13e   :  { %2151 = vmatpush3.msra.mxu0 %v1042_v27  ;;  %2188 = vmatpush3.msra.mxu1 %v1025_v28  ;;  %v1318_v27 = vld [vmem:[#allocation4 + $0x628] sm:$0xff]  ;;  %v1301_v28 = vld [vmem:[#allocation4 + $0x5a0] sm:$0xff] }
 0x13f   :  { %2152 = vmatprep.subr.mxu0 %v2401_v0  ;;  %2189 = vmatprep.subr.mxu1 %v2401_v0 }
 0x140   :  { %2153 = vmatpush3.msra.mxu0 %v1041_v29  ;;  %2190 = vmatpush3.msra.mxu1 %v1024_v30  ;;  %v1317_v29 = vld [vmem:[#allocation4 + $0x620] sm:$0xff]  ;;  %v1300_v30 = vld [vmem:[#allocation4 + $0x598] sm:$0xff] }
 0x141   :  { %2154 = vmatprep.subr.mxu0 %v2401_v0  ;;  %2191 = vmatprep.subr.mxu1 %v2401_v0 }
 0x142   :  { %2155 = vmatpush3.msra.mxu0 %v1040_v31  ;;  %2192 = vmatpush3.msra.mxu1 %v1023_v32  ;;  %v1316_v31 = vld [vmem:[#allocation4 + $0x618] sm:$0xff]  ;;  %v1299_v32 = vld [vmem:[#allocation4 + $0x590] sm:$0xff] }
 0x143   :  { %2156 = vmatprep.subr.mxu0 %v2401_v0  ;;  %2193 = vmatprep.subr.mxu1 %v2401_v0 }
 0x144   :  { %2157 = vmatpush3.msra.mxu0 %v1039_v33  ;;  %2194 = vmatpush3.msra.mxu1 %v1022_v34  ;;  %v1315_v33 = vld [vmem:[#allocation4 + $0x610] sm:$0xff]  ;;  %v1298_v34 = vld [vmem:[#allocation4 + $0x588] sm:$0xff] }
 0x145   :  { %2158 = vmatprep.subr.mxu0 %v2401_v0  ;;  %2195 = vmatprep.subr.mxu1 %v2401_v0 }
 0x146   :  { %2159 = vmatpush3.msra.mxu0 %v1038_v35  ;;  %2196 = vmatpush3.msra.mxu1 %v1021_v36  ;;  %v1314_v35 = vld [vmem:[#allocation4 + $0x608] sm:$0xff]  ;;  %v1297_v36 = vld [vmem:[#allocation4 + $0x580] sm:$0xff] }
 0x147   :  { %2160 = vmatprep.subr.mxu0 %v2401_v0  ;;  %2197 = vmatprep.subr.mxu1 %v2401_v0 }
 0x148   :  { %2161 = vmatpush3.msra.mxu0 %v1037_v38  ;;  %2198 = vmatpush3.msra.mxu1 %v1020_v40  ;;  %v1313_v38 = vld [vmem:[#allocation4 + $0x600] sm:$0xff]  ;;  %v1296_v40 = vld [vmem:[#allocation4 + $0x578] sm:$0xff] }
 0x149   :  { %2162 = vmatprep.subr.mxu0 %v2401_v0  ;;  %2237 = vmatprep.subr.mxu1 %v2401_v0 }
 0x14a   :  { %2163 = vmatpush3.msra.mxu0 %v1036_v41  ;;  %v1312_v41 = vld [vmem:[#allocation4 + $0x5f8] sm:$0xff] }
 0x14b   :  { %2202 = vmatprep.subr.mxu0 %v2401_v0 }
 0x1b3   :  { %v1859_v44 = vpop.f32.mrf.mxu1 }
 0x1b5   :  { %v1860_v45 = vpop.f32.mrf.mxu1 }
 0x1b6   :  { %v1861_v52 = vadd.f32 %v1860_v45, %v1859_v44  ;;  %v1294_v44 = vld [vmem:[#allocation4 + $0x568] sm:$0xff] }
 0x1b7   :  { %v1310_v45 = vld [vmem:[#allocation4 + $0x5e8] sm:$0xff] }
 0x1b8   :  { %v672_v42 = vpop.f32.mrf.mxu0 }
 0x1b9   :  { %v673_v54 = vadd.f32 %v1861_v52, %v672_v42  ;;  %v1295_v42 = vld [vmem:[#allocation4 + $0x570] sm:$0xff] }
 0x1ba   :  { %v2093_v43 = vpop.f32.mrf.mxu0  ;;  %v1307_v52 = vld [vmem:[#allocation4 + $0x5d0] sm:$0xff] }
 0x1bb   :  { %v1311_v43 = vld [vmem:[#allocation4 + $0x5f0] sm:$0xff] }
 0x1c3   :  { %v814_v46 = vpop.f32.mrf.mxu1 }
 0x1c5   :  { %v2112_v47 = vpop.f32.mrf.mxu1 }
 0x1c6   :  { %v1309_v47 = vld [vmem:[#allocation4 + $0x5e0] sm:$0xff] }
 0x1da   :  { %v1903_v48 = vpop.f32.mrf.mxu0 }
 0x1dc   :  { %v1904_v49 = vpop.f32.mrf.mxu0 }
 0x1dd   :  { %v1905_v53 = vadd.f32 %v1904_v49, %v1903_v48  ;;  %v1292_v48 = vld [vmem:[#allocation4 + $0x558] sm:$0xff] }
 0x1de   :  { %v1308_v49 = vld [vmem:[#allocation4 + $0x5d8] sm:$0xff] }
 0x1df   :  { %v745_v56 = vadd.f32 %v1905_v53, %v673_v54 }
 0x1e1   :  { %v815_v59 = vadd.f32 %v814_v46, %v745_v56  ;;  %v1293_v46 = vld [vmem:[#allocation4 + $0x560] sm:$0xff] }
 0x1e4   :  { %v1947_v50 = vpop.f32.mrf.mxu1 }
 0x1e6   :  { %v1948_v55 = vpop.f32.mrf.mxu1 }
 0x1e7   :  { %v1949_v57 = vadd.f32 %v1948_v55, %v1947_v50  ;;  %v1291_v50 = vld [vmem:[#allocation4 + $0x550] sm:$0xff] }
 0x1eb   :  { %v1008_v58 = vpop.f32.mrf.mxu0 }
 0x1ec   :  { %v1009_v60 = vadd.f32 %v1949_v57, %v1008_v58 }
 0x1ed   :  { %v2131_v8 = vpop.f32.mrf.mxu0 }
 0x1ee   :  { %v1012_v9 = vadd.f32 %v1009_v60, %v815_v59  ;;  %v1817_v59 = vld [vmem:[#allocation4 + $0x548] ss:$0 sm:$0xff] }
 0x1f0   :  { %v1018_v51 = vadd.f32 %v1816_v61, %v1012_v9 }
 0x1f2   :  { %v1019_v62 = vmax.f32 %v1018_v51, 0.0 }
 0x1f4   :  { %2200 = vmatmul.mubr.f32.vlgmr.msra.gmra.mxu1 %v1019_v62  ;;  %v1053_v63 = vrot.slane %v1019_v62, 1  ;;  %v1211_v15 = vrot.slane %v1019_v62, 2  ;;  %v1481_v62 = vld [vmem:[#allocation4 + $0x6c8] sm:$0xff] }
 0x1f5   :  { %2269 = vmatprep.mubr.msk.f32.mxu1 %vm2402_vm2, %v2401_v0  ;;  %2238 = vmatpush3.msra.mxu1 %v1322_v17  ;;  %v1624_v17 = vld [vmem:[#allocation2 + $0x1f0] sm:$0xff] }
 0x1f6   :  { %2165 = vmatmul.mubr.f32.vlgmr.msra.gmra.mxu0 %v1053_v63  ;;  %2239 = vmatprep.subr.mxu1 %v2401_v0  ;;  %v1480_v63 = vld [vmem:[#allocation4 + $0x6c0] sm:$0xff] }
 0x1f7   :  { %2203 = vmatpush3.msra.mxu0 %v1210_v21  ;;  %2234 = vmatprep.mubr.msk.f32.mxu0 %vm2402_vm2, %v2401_v0  ;;  %v1479_v21 = vld [vmem:[#allocation4 + $0x6b8] sm:$0xff] }
 0x1f8   :  { %2204 = vmatprep.subr.mxu0 %v2401_v0  ;;  %2240 = vmatpush3.msra.mxu1 %v1321_v19  ;;  %v1621_v19 = vld [vmem:[#allocation2 + $0x1d8] sm:$0xff] }
 0x1f9   :  { %2205 = vmatpush3.msra.mxu0 %v1209_v1  ;;  %2241 = vmatprep.subr.mxu1 %v2401_v0  ;;  %v1478_v1 = vld [vmem:[#allocation4 + $0x6b0] sm:$0xff] }
 0x1fa   :  { %2206 = vmatprep.subr.mxu0 %v2401_v0  ;;  %2242 = vmatpush3.msra.mxu1 %v1320_v23  ;;  %v1620_v23 = vld [vmem:[#allocation2 + $0x1d0] sm:$0xff] }
 0x1fb   :  { %2207 = vmatpush3.msra.mxu0 %v1208_v22  ;;  %2243 = vmatprep.subr.mxu1 %v2401_v0  ;;  %v1477_v22 = vld [vmem:[#allocation4 + $0x6a8] sm:$0xff] }
 0x1fc   :  { %2208 = vmatprep.subr.mxu0 %v2401_v0  ;;  %2244 = vmatpush3.msra.mxu1 %v1319_v25  ;;  %v1617_v25 = vld [vmem:[#allocation2 + $0x1b8] sm:$0xff] }
 0x1fd   :  { %2209 = vmatpush3.msra.mxu0 %v1207_v2  ;;  %2245 = vmatprep.subr.mxu1 %v2401_v0  ;;  %v1476_v2 = vld [vmem:[#allocation4 + $0x6a0] sm:$0xff] }
 0x1fe   :  { %2210 = vmatprep.subr.mxu0 %v2401_v0  ;;  %2246 = vmatpush3.msra.mxu1 %v1318_v27  ;;  %v1616_v27 = vld [vmem:[#allocation2 + $0x1b0] sm:$0xff] }
 0x1ff   :  { %2211 = vmatpush3.msra.mxu0 %v1206_v3  ;;  %2247 = vmatprep.subr.mxu1 %v2401_v0  ;;  %v1475_v3 = vld [vmem:[#allocation4 + $0x698] sm:$0xff] }
 0x200   :  { %2212 = vmatprep.subr.mxu0 %v2401_v0  ;;  %2248 = vmatpush3.msra.mxu1 %v1317_v29  ;;  %v1610_v29 = vld [vmem:[#allocation2 + $0x180] sm:$0xff] }
 0x201   :  { %2213 = vmatpush3.msra.mxu0 %v1205_v4  ;;  %2249 = vmatprep.subr.mxu1 %v2401_v0  ;;  %v1474_v4 = vld [vmem:[#allocation4 + $0x690] sm:$0xff] }
 0x202   :  { %2214 = vmatprep.subr.mxu0 %v2401_v0  ;;  %2250 = vmatpush3.msra.mxu1 %v1316_v31  ;;  %v1607_v31 = vld [vmem:[#allocation2 + $0x168] sm:$0xff] }
 0x203   :  { %2215 = vmatpush3.msra.mxu0 %v1204_v5  ;;  %2251 = vmatprep.subr.mxu1 %v2401_v0  ;;  %v1473_v5 = vld [vmem:[#allocation4 + $0x688] sm:$0xff] }
 0x204   :  { %2216 = vmatprep.subr.mxu0 %v2401_v0  ;;  %2252 = vmatpush3.msra.mxu1 %v1315_v33  ;;  %v1606_v33 = vld [vmem:[#allocation2 + $0x160] sm:$0xff] }
 0x205   :  { %2217 = vmatpush3.msra.mxu0 %v1203_v39  ;;  %2253 = vmatprep.subr.mxu1 %v2401_v0  ;;  %v1472_v39 = vld [vmem:[#allocation4 + $0x680] sm:$0xff] }
 0x206   :  { %2218 = vmatprep.subr.mxu0 %v2401_v0  ;;  %2254 = vmatpush3.msra.mxu1 %v1314_v35  ;;  %v1603_v35 = vld [vmem:[#allocation2 + $0x148] sm:$0xff] }
 0x207   :  { %2219 = vmatpush3.msra.mxu0 %v1202_v6  ;;  %2255 = vmatprep.subr.mxu1 %v2401_v0  ;;  %v1471_v6 = vld [vmem:[#allocation4 + $0x678] sm:$0xff] }
 0x208   :  { %2220 = vmatprep.subr.mxu0 %v2401_v0  ;;  %2256 = vmatpush3.msra.mxu1 %v1313_v38  ;;  %v1602_v38 = vld [vmem:[#allocation2 + $0x140] sm:$0xff] }
 0x209   :  { %2221 = vmatpush3.msra.mxu0 %v1201_v7  ;;  %2257 = vmatprep.subr.mxu1 %v2401_v0  ;;  %v1470_v7 = vld [vmem:[#allocation4 + $0x670] sm:$0xff] }
 0x20a   :  { %2222 = vmatprep.subr.mxu0 %v2401_v0  ;;  %2258 = vmatpush3.msra.mxu1 %v1312_v41  ;;  %v1599_v41 = vld [vmem:[#allocation2 + $0x128] sm:$0xff] }
 0x20b   :  { %2223 = vmatpush3.msra.mxu0 %v1200_v10  ;;  %2259 = vmatprep.subr.mxu1 %v2401_v0  ;;  %v1469_v10 = vld [vmem:[#allocation4 + $0x668] sm:$0xff] }
 0x20c   :  { %2224 = vmatprep.subr.mxu0 %v2401_v0  ;;  %2260 = vmatpush3.msra.mxu1 %v1311_v43  ;;  %v1598_v43 = vld [vmem:[#allocation2 + $0x120] sm:$0xff] }
 0x20d   :  { %2225 = vmatpush3.msra.mxu0 %v1199_v37  ;;  %2261 = vmatprep.subr.mxu1 %v2401_v0  ;;  %v1468_v37 = vld [vmem:[#allocation4 + $0x660] sm:$0xff] }
 0x20e   :  { %2226 = vmatprep.subr.mxu0 %v2401_v0  ;;  %2262 = vmatpush3.msra.mxu1 %v1310_v45  ;;  %v1595_v45 = vld [vmem:[#allocation2 + $0x108] sm:$0xff] }
 0x20f   :  { %2227 = vmatpush3.msra.mxu0 %v1198_v11  ;;  %2263 = vmatprep.subr.mxu1 %v2401_v0  ;;  %v1467_v11 = vld [vmem:[#allocation4 + $0x658] sm:$0xff] }
 0x210   :  { %2228 = vmatprep.subr.mxu0 %v2401_v0  ;;  %2264 = vmatpush3.msra.mxu1 %v1309_v47  ;;  %v1594_v47 = vld [vmem:[#allocation2 + $0x100] sm:$0xff] }
 0x211   :  { %2229 = vmatpush3.msra.mxu0 %v1197_v12  ;;  %2265 = vmatprep.subr.mxu1 %v2401_v0  ;;  %v1466_v12 = vld [vmem:[#allocation4 + $0x650] sm:$0xff] }
 0x212   :  { %2230 = vmatprep.subr.mxu0 %v2401_v0  ;;  %2266 = vmatpush3.msra.mxu1 %v1308_v49  ;;  %v1591_v49 = vld [vmem:[#allocation2 + $0xe8] sm:$0xff] }
 0x213   :  { %2231 = vmatpush3.msra.mxu0 %v1196_v13  ;;  %2267 = vmatprep.subr.mxu1 %v2401_v0 }
 0x214   :  { %2232 = vmatprep.subr.mxu0 %v2401_v0  ;;  %2268 = vmatpush3.msra.mxu1 %v1307_v52  ;;  %v1590_v52 = vld [vmem:[#allocation2 + $0xe0] sm:$0xff] }
 0x215   :  { %2233 = vmatpush3.msra.mxu0 %v1195_v14  ;;  %2307 = vmatprep.subr.mxu1 %v2401_v0  ;;  %v1623_v14 = vld [vmem:[#allocation2 + $0x1e8] sm:$0xff] }
 0x216   :  { %2235 = vmatmul.mubr.f32.vlgmr.msra.gmra.mxu0 %v1211_v15  ;;  %2272 = vmatprep.subr.mxu0 %v2401_v0  ;;  %v1625_v15 = vld [vmem:[#allocation2 + $0x1f8] sm:$0xff] }
 0x217   :  { %2304 = vmatprep.mubr.msk.f32.mxu0 %vm2402_vm2, %v2401_v0  ;;  %2273 = vmatpush3.msra.mxu0 %v1306_v16  ;;  %v1622_v16 = vld [vmem:[#allocation2 + $0x1e0] sm:$0xff] }
 0x218   :  { %2274 = vmatprep.subr.mxu0 %v2401_v0 }
 0x219   :  { %2275 = vmatpush3.msra.mxu0 %v1305_v18  ;;  %v1619_v18 = vld [vmem:[#allocation2 + $0x1c8] sm:$0xff] }
 0x21a   :  { %2276 = vmatprep.subr.mxu0 %v2401_v0 }
 0x21b   :  { %2277 = vmatpush3.msra.mxu0 %v1304_v20  ;;  %v1618_v20 = vld [vmem:[#allocation2 + $0x1c0] sm:$0xff] }
 0x21c   :  { %2278 = vmatprep.subr.mxu0 %v2401_v0 }
 0x21d   :  { %2279 = vmatpush3.msra.mxu0 %v1303_v24  ;;  %v1615_v24 = vld [vmem:[#allocation2 + $0x1a8] sm:$0xff] }
 0x21e   :  { %2280 = vmatprep.subr.mxu0 %v2401_v0 }
 0x21f   :  { %2281 = vmatpush3.msra.mxu0 %v1302_v26  ;;  %v1614_v26 = vld [vmem:[#allocation2 + $0x1a0] sm:$0xff] }
 0x220   :  { %2282 = vmatprep.subr.mxu0 %v2401_v0 }
 0x221   :  { %2283 = vmatpush3.msra.mxu0 %v1301_v28  ;;  %v1613_v28 = vld [vmem:[#allocation2 + $0x198] sm:$0xff] }
 0x222   :  { %2284 = vmatprep.subr.mxu0 %v2401_v0 }
 0x223   :  { %2285 = vmatpush3.msra.mxu0 %v1300_v30  ;;  %v1612_v30 = vld [vmem:[#allocation2 + $0x190] sm:$0xff] }
 0x224   :  { %2286 = vmatprep.subr.mxu0 %v2401_v0 }
 0x225   :  { %2287 = vmatpush3.msra.mxu0 %v1299_v32  ;;  %v1609_v32 = vld [vmem:[#allocation2 + $0x178] sm:$0xff] }
 0x226   :  { %2288 = vmatprep.subr.mxu0 %v2401_v0 }
 0x227   :  { %2289 = vmatpush3.msra.mxu0 %v1298_v34  ;;  %v1608_v34 = vld [vmem:[#allocation2 + $0x170] sm:$0xff] }
 0x228   :  { %2290 = vmatprep.subr.mxu0 %v2401_v0 }
 0x229   :  { %2291 = vmatpush3.msra.mxu0 %v1297_v36  ;;  %v1605_v36 = vld [vmem:[#allocation2 + $0x158] sm:$0xff] }
 0x22a   :  { %2292 = vmatprep.subr.mxu0 %v2401_v0 }
 0x22b   :  { %2293 = vmatpush3.msra.mxu0 %v1296_v40  ;;  %v1604_v40 = vld [vmem:[#allocation2 + $0x150] sm:$0xff] }
 0x22c   :  { %2294 = vmatprep.subr.mxu0 %v2401_v0 }
 0x22d   :  { %2295 = vmatpush3.msra.mxu0 %v1295_v42  ;;  %v1601_v42 = vld [vmem:[#allocation2 + $0x138] sm:$0xff] }
 0x22e   :  { %2296 = vmatprep.subr.mxu0 %v2401_v0 }
 0x22f   :  { %2297 = vmatpush3.msra.mxu0 %v1294_v44  ;;  %v1600_v44 = vld [vmem:[#allocation2 + $0x130] sm:$0xff] }
 0x230   :  { %2298 = vmatprep.subr.mxu0 %v2401_v0 }
 0x231   :  { %2299 = vmatpush3.msra.mxu0 %v1293_v46  ;;  %v1597_v46 = vld [vmem:[#allocation2 + $0x118] sm:$0xff] }
 0x232   :  { %2300 = vmatprep.subr.mxu0 %v2401_v0 }
 0x233   :  { %2301 = vmatpush3.msra.mxu0 %v1292_v48  ;;  %v1596_v48 = vld [vmem:[#allocation2 + $0x110] sm:$0xff] }
 0x234   :  { %2302 = vmatprep.subr.mxu0 %v2401_v0 }
 0x235   :  { %2303 = vmatpush3.msra.mxu0 %v1291_v50  ;;  %v1593_v50 = vld [vmem:[#allocation2 + $0xf8] sm:$0xff] }
 0x236   :  { %1626 = vmatprep.subr.mxu0 %v1623_v14 }
 0x2b4   :  { %v1191_v53 = vpop.f32.mrf.mxu1 }
 0x2b6   :  { %v1121_v54 = vpop.f32.mrf.mxu0  ;;  %v2201_v55 = vpop.f32.mrf.mxu1 }
 0x2b7   :  { %v1192_v57 = vadd.f32 %v1191_v53, %v1121_v54  ;;  %v1592_v53 = vld [vmem:[#allocation2 + $0xf0] sm:$0xff]  ;;  %v1587_v54 = vld [vmem:[#allocation2 + $0xc8] sm:$0xff]  ;;  %v1589_v55 = vld [vmem:[#allocation2 + $0xd8] sm:$0xff] }
 0x2b8   :  { %v2166_v56 = vpop.f32.mrf.mxu0 }
 0x2b9   :  { %v1586_v56 = vld [vmem:[#allocation2 + $0xc0] sm:$0xff] }
 0x2d6   :  { %v1279_v58 = vpop.f32.mrf.mxu0 }
 0x2d7   :  { %v1283_v60 = vadd.f32 %v1279_v58, %v1192_v57  ;;  %v1588_v57 = vld [vmem:[#allocation2 + $0xd0] sm:$0xff]  ;;  %v1583_v58 = vld [vmem:[#allocation2 + $0xa8] sm:$0xff] }
 0x2d8   :  { %v2236_v61 = vpop.f32.mrf.mxu0 }
 0x2d9   :  { %v1289_v8 = vadd.f32 %v1817_v59, %v1283_v60  ;;  %v1585_v59 = vld [vmem:[#allocation2 + $0xb8] sm:$0xff]  ;;  %v1582_v60 = vld [vmem:[#allocation2 + $0xa0] sm:$0xff]  ;;  %v1584_v61 = vld [vmem:[#allocation2 + $0xb0] sm:$0xff] }
 0x2db   :  { %v1290_v9 = vmax.f32 %v1289_v8, 0.0  ;;  %v1579_v8 = vld [vmem:[#allocation2 + $0x88] sm:$0xff] }
 0x2dd   :  { %2305 = vmatmul.mubr.f32.vlgmr.msra.gmra.mxu0 %v1290_v9  ;;  %v1324_v51 = vrot.slane %v1290_v9, 1  ;;  %v1482_v13 = vrot.slane %v1290_v9, 2  ;;  %v1581_v9 = vld [vmem:[#allocation2 + $0x98] sm:$0xff] }
 0x2de   :  { %1690 = vmatprep.mubr.f32.mxu0 %v2401_v0  ;;  %1627 = vmatpush1.msra.mxu0 %v1622_v16 }
 0x2df   :  { %2270 = vmatmul.mubr.f32.vlgmr.msra.gmra.mxu1 %v1324_v51  ;;  %1628 = vmatprep.subr.mxu0 %v1619_v18  ;;  %v1578_v51 = vld [vmem:[#allocation2 + $0x80] sm:$0xff] }
 0x2e0   :  { %2308 = vmatpush3.msra.mxu1 %v1481_v62  ;;  %2339 = vmatprep.mubr.msk.f32.mxu1 %vm2402_vm2, %v2401_v0  ;;  %v1580_v62 = vld [vmem:[#allocation2 + $0x90] sm:$0xff] }
 0x2e1   :  { %2309 = vmatprep.subr.mxu1 %v2401_v0  ;;  %1629 = vmatpush1.msra.mxu0 %v1618_v20  ;;  %v1818_v20 = vld [vmem:[#allocation4 + $0x6d0] ss:$0 sm:$0xff] }
 0x2e2   :  { %2310 = vmatpush3.msra.mxu1 %v1480_v63  ;;  %1630 = vmatprep.subr.mxu0 %v1615_v24  ;;  %v1575_v63 = vld [vmem:[#allocation2 + $0x68] sm:$0xff] }
 0x2e3   :  { %2311 = vmatprep.subr.mxu1 %v2401_v0  ;;  %1631 = vmatpush1.msra.mxu0 %v1614_v26 }
 0x2e4   :  { %2312 = vmatpush3.msra.mxu1 %v1479_v21  ;;  %v1577_v21 = vld [vmem:[#allocation2 + $0x78] sm:$0xff] }
 0x2e5   :  { %2313 = vmatprep.subr.mxu1 %v2401_v0 }
 0x2e6   :  { %2314 = vmatpush3.msra.mxu1 %v1478_v1  ;;  %v1574_v1 = vld [vmem:[#allocation2 + $0x60] sm:$0xff] }
 0x2e7   :  { %2315 = vmatprep.subr.mxu1 %v2401_v0 }
 0x2e8   :  { %2316 = vmatpush3.msra.mxu1 %v1477_v22  ;;  %v1576_v22 = vld [vmem:[#allocation2 + $0x70] sm:$0xff] }
 0x2e9   :  { %2317 = vmatprep.subr.mxu1 %v2401_v0 }
 0x2ea   :  { %2318 = vmatpush3.msra.mxu1 %v1476_v2  ;;  %v1571_v2 = vld [vmem:[#allocation2 + $0x48] sm:$0xff] }
 0x2eb   :  { %2319 = vmatprep.subr.mxu1 %v2401_v0 }
 0x2ec   :  { %2320 = vmatpush3.msra.mxu1 %v1475_v3  ;;  %v1573_v3 = vld [vmem:[#allocation2 + $0x58] sm:$0xff] }
 0x2ed   :  { %2321 = vmatprep.subr.mxu1 %v2401_v0 }
 0x2ee   :  { %2322 = vmatpush3.msra.mxu1 %v1474_v4  ;;  %v1570_v4 = vld [vmem:[#allocation2 + $0x40] sm:$0xff] }
 0x2ef   :  { %2323 = vmatprep.subr.mxu1 %v2401_v0 }
 0x2f0   :  { %2324 = vmatpush3.msra.mxu1 %v1473_v5  ;;  %v1572_v5 = vld [vmem:[#allocation2 + $0x50] sm:$0xff] }
 0x2f1   :  { %2325 = vmatprep.subr.mxu1 %v2401_v0 }
 0x2f2   :  { %2326 = vmatpush3.msra.mxu1 %v1472_v39  ;;  %v1567_v39 = vld [vmem:[#allocation2 + $0x28] sm:$0xff] }
 0x2f3   :  { %2327 = vmatprep.subr.mxu1 %v2401_v0 }
 0x2f4   :  { %2328 = vmatpush3.msra.mxu1 %v1471_v6  ;;  %v1569_v6 = vld [vmem:[#allocation2 + $0x38] sm:$0xff] }
 0x2f5   :  { %2329 = vmatprep.subr.mxu1 %v2401_v0 }
 0x2f6   :  { %2330 = vmatpush3.msra.mxu1 %v1470_v7  ;;  %v1566_v7 = vld [vmem:[#allocation2 + $0x20] sm:$0xff] }
 0x2f7   :  { %2331 = vmatprep.subr.mxu1 %v2401_v0 }
 0x2f8   :  { %2332 = vmatpush3.msra.mxu1 %v1469_v10  ;;  %v1568_v10 = vld [vmem:[#allocation2 + $0x30] sm:$0xff] }
 0x2f9   :  { %2333 = vmatprep.subr.mxu1 %v2401_v0 }
 0x2fa   :  { %2334 = vmatpush3.msra.mxu1 %v1468_v37  ;;  %v1563_v37 = vld [vmem:[#allocation2 + $0x8] sm:$0xff] }
 0x2fb   :  { %2335 = vmatprep.subr.mxu1 %v2401_v0 }
 0x2fc   :  { %2336 = vmatpush3.msra.mxu1 %v1467_v11  ;;  %v1565_v11 = vld [vmem:[#allocation2 + $0x18] sm:$0xff] }
 0x2fd   :  { %2337 = vmatprep.subr.mxu1 %v2401_v0 }
 0x2fe   :  { %2338 = vmatpush3.msra.mxu1 %v1466_v12  ;;  %v1562_v12 = vld [vmem:[#allocation2] sm:$0xff] }
 0x2ff   :  { %2340 = vmatmul.mubr.f32.vlgmr.msra.gmra.mxu1 %v1482_v13  ;;  %1697 = vmatprep.subr.mxu1 %v1625_v15  ;;  %v1564_v13 = vld [vmem:[#allocation2 + $0x10] sm:$0xff] }
 0x300   :  { %1761 = vmatprep.mubr.f32.mxu1 %v2401_v0  ;;  %1698 = vmatpush1.msra.mxu1 %v1624_v17  ;;  %v1611_v0 = vld [vmem:[#allocation2 + $0x188] sm:$0xff] }
 0x301   :  { %1699 = vmatprep.subr.mxu1 %v1621_v19  ;;  %1632 = vmatprep.subr.mxu0 %v1611_v0  ;;  %v1768_v0 = vld [vmem:[#allocation4 + $0x6d8] sm:$0x1] }
 0x302   :  { %1700 = vmatpush1.msra.mxu1 %v1620_v23  ;;  %1633 = vmatpush1.msra.mxu0 %v1610_v29 }
 0x303   :  { %1701 = vmatprep.subr.mxu1 %v1617_v25  ;;  %1634 = vmatprep.subr.mxu0 %v1607_v31 }
 0x304   :  { %1702 = vmatpush1.msra.mxu1 %v1616_v27  ;;  %1635 = vmatpush1.msra.mxu0 %v1606_v33 }
 0x305   :  { %1703 = vmatprep.subr.mxu1 %v1613_v28  ;;  %1636 = vmatprep.subr.mxu0 %v1603_v35 }
 0x306   :  { %1704 = vmatpush1.msra.mxu1 %v1612_v30  ;;  %1637 = vmatpush1.msra.mxu0 %v1602_v38 }
 0x307   :  { %1705 = vmatprep.subr.mxu1 %v1609_v32  ;;  %1638 = vmatprep.subr.mxu0 %v1599_v41 }
 0x308   :  { %1706 = vmatpush1.msra.mxu1 %v1608_v34  ;;  %1639 = vmatpush1.msra.mxu0 %v1598_v43 }
 0x309   :  { %1707 = vmatprep.subr.mxu1 %v1605_v36  ;;  %1640 = vmatprep.subr.mxu0 %v1595_v45 }
 0x30a   :  { %1708 = vmatpush1.msra.mxu1 %v1604_v40  ;;  %1641 = vmatpush1.msra.mxu0 %v1594_v47 }
 0x30b   :  { %1709 = vmatprep.subr.mxu1 %v1601_v42  ;;  %1642 = vmatprep.subr.mxu0 %v1591_v49 }
 0x30c   :  { %1710 = vmatpush1.msra.mxu1 %v1600_v44  ;;  %1643 = vmatpush1.msra.mxu0 %v1590_v52 }
 0x30d   :  { %1711 = vmatprep.subr.mxu1 %v1597_v46  ;;  %1644 = vmatprep.subr.mxu0 %v1587_v54 }
 0x30e   :  { %1712 = vmatpush1.msra.mxu1 %v1596_v48  ;;  %1645 = vmatpush1.msra.mxu0 %v1586_v56 }
 0x30f   :  { %1713 = vmatprep.subr.mxu1 %v1593_v50  ;;  %1646 = vmatprep.subr.mxu0 %v1583_v58 }
 0x310   :  { %1714 = vmatpush1.msra.mxu1 %v1592_v53  ;;  %1647 = vmatpush1.msra.mxu0 %v1582_v60 }
 0x311   :  { %1715 = vmatprep.subr.mxu1 %v1589_v55  ;;  %1648 = vmatprep.subr.mxu0 %v1579_v8 }
 0x312   :  { %1716 = vmatpush1.msra.mxu1 %v1588_v57  ;;  %1649 = vmatpush1.msra.mxu0 %v1578_v51 }
 0x313   :  { %1717 = vmatprep.subr.mxu1 %v1585_v59  ;;  %1650 = vmatprep.subr.mxu0 %v1575_v63 }
 0x314   :  { %1718 = vmatpush1.msra.mxu1 %v1584_v61  ;;  %1651 = vmatpush1.msra.mxu0 %v1574_v1 }
 0x315   :  { %1719 = vmatprep.subr.mxu1 %v1581_v9  ;;  %1652 = vmatprep.subr.mxu0 %v1571_v2 }
 0x316   :  { %1720 = vmatpush1.msra.mxu1 %v1580_v62  ;;  %1653 = vmatpush1.msra.mxu0 %v1570_v4 }
 0x317   :  { %1721 = vmatprep.subr.mxu1 %v1577_v21  ;;  %1654 = vmatprep.subr.mxu0 %v1567_v39 }
 0x318   :  { %1722 = vmatpush1.msra.mxu1 %v1576_v22  ;;  %1655 = vmatpush1.msra.mxu0 %v1566_v7 }
 0x319   :  { %1723 = vmatprep.subr.mxu1 %v1573_v3  ;;  %1656 = vmatprep.subr.mxu0 %v1563_v37 }
 0x31a   :  { %1724 = vmatpush1.msra.mxu1 %v1572_v5  ;;  %1657 = vmatpush1.msra.mxu0 %v1562_v12 }
 0x31b   :  { %1725 = vmatprep.subr.mxu1 %v1569_v6 }
 0x31c   :  { %1726 = vmatpush1.msra.mxu1 %v1568_v10 }
 0x31d   :  { %1727 = vmatprep.subr.mxu1 %v1565_v11 }
 0x31e   :  { %1728 = vmatpush1.msra.mxu1 %v1564_v13 }
 0x39d   :  { %v1462_v14 = vpop.f32.mrf.mxu0 }
 0x39f   :  { %v1392_v15 = vpop.f32.mrf.mxu1  ;;  %v2306_v16 = vpop.f32.mrf.mxu0 }
 0x3a0   :  { %v1463_v18 = vadd.f32 %v1462_v14, %v1392_v15 }
 0x3a1   :  { %v2271_v17 = vpop.f32.mrf.mxu1 }
 0x3bf   :  { %v1550_v19 = vpop.f32.mrf.mxu1 }
 0x3c0   :  { %v1554_v23 = vadd.f32 %v1550_v19, %v1463_v18 }
 0x3c1   :  { %v2341_v24 = vpop.f32.mrf.mxu1 }
 0x3c2   :  { %v1560_v25 = vadd.f32 %v1818_v20, %v1554_v23 }
 0x3c4   :  { %v1561_v26 = vmax.f32 %v1560_v25, 0.0 }
 0x3c6   :  { %1691 = vmatmul.mubr.f32.vlgmr.msra.gmra.mxu0 %v1561_v26  ;;  %1762 = vmatmul.mubr.f32.vlgmr.msra.gmra.mxu1 %v1561_v26 }
 0x486   :  { %v1692_v27 = vpop.f32.mrf.mxu0  ;;  %v1763_v28 = vpop.f32.mrf.mxu1 }
 0x487   :  { %v1769_v30 = vadd.f32 %v1768_v0, %v1692_v27  ;;  %v1775_v33 = vrot.slane %v1763_v28, 2 }
 0x488   :  { %v1694_v29 = vpop.f32.mrf.mxu0  ;;  %v1765_v32 = vpop.f32.mrf.mxu1 }
 0x489   :  { %v1771_v31 = vrot.slane %v1694_v29, 1  ;;  %v1779_v36 = vrot.slane %v1765_v32, 3 }
 0x48b   :  { %v1773_v34 = vadd.f32 %v1771_v31, %v1769_v30 }
 0x48d   :  { %v1777_v35 = vadd.f32 %v1775_v33, %v1773_v34 }
 0x48f   :  { %v1781_v38 = vadd.f32 %v1779_v36, %v1777_v35 }
 0x491   :  { %1782 = vst [vmem:[%s2676_s3] sm:$0x1] %v1781_v38 }
 0x492   :  { %1787 = vsyncpa [#allocation3], 1 }
 0x493   :  { %1788 = vsyncpa [#allocation5], 1 }

</bundles_post_ra>
